<compile_context>
chip_gen: v6e
topology: v6e:2x2x1
jax: 0.10.0
libtpu: 0.0.40
codegen_flags: <defaults>
</compile_context>

<pallas_src>
import functools

import jax
import jax.numpy as jnp
from jax import lax
from jax.experimental import pallas as pl
from jax.experimental.pallas import tpu as pltpu


# ---------------------------------------------------------------------------
# Fused Pallas kernel: encoder + layer loop + losses + final energies
# ---------------------------------------------------------------------------

def fused_hpp_kernel(v_ref, e_ref, deg_ref, mnm_ref, w_ref, b_ref,
                     pq_out_ref, loss_ref, hd_ref,
                     *, tau, layers, dissipate, pq):
    f32 = jnp.float32
    bf16 = jnp.bfloat16

    e = e_ref[...]            # (N, N)  bf16, symmetric: e + e^T
    deg = deg_ref[...]        # (N, 1)  f32, row sums of e_sym (exact, computed in f32)
    mnm = mnm_ref[...]        # (M, N)  f32 (tiny matmuls; kept f32 for loss fidelity)

    # -------- encoder + per-node constants (hoisted out of the layer loop) ----
    # one fused projection: v @ [Wp | Wq | Wc | Wm | Wf]
    z = jnp.dot(v_ref[...], w_ref[...], preferred_element_type=f32) + b_ref[...]
    p0 = z[:, 0:pq]
    q0 = z[:, pq:2 * pq]
    c = z[:, 2 * pq:3 * pq]
    zm = z[:, 3 * pq:3 * pq + 1]
    zf = z[:, 3 * pq + 1:3 * pq + 2]
    # numerically-stable softplus / sigmoid (f32 VPU/EUP math)
    mass = jnp.log(1.0 + jnp.exp(-jnp.abs(zm))) + jnp.maximum(zm, 0.0)
    fric = 1.0 / (1.0 + jnp.exp(-zf))

    tau_f = jnp.float32(tau)

    def euler_step(carry):
        if dissipate:
            p, q, sl, cl = carry
        else:
            p, q, p_sum, q_sum, sl, cl = carry
        # single MXU pass over the symmetric edge matrix per layer
        eq = jnp.dot(e, q.astype(bf16), preferred_element_type=f32)   # e_sym @ q
        dq = mass * p
        dp = -(0.5 * (deg * q - eq) + (q - c))
        if dissipate:
            dp = dp - fric * p
        dpt = tau_f * dp                   # == p_new - p
        p_new = p + dpt
        q_new = q + tau_f * dq
        # s_loss term: ||dq - p||_F ; c_loss term: ||mnm @ (p_new - p)||_F
        diff = dq - p
        sl = sl + jnp.sqrt(jnp.sum(diff * diff))
        mdp = jnp.dot(mnm, dpt, preferred_element_type=f32)
        cl = cl + jnp.sqrt(jnp.sum(mdp * mdp))
        if dissipate:
            return (p_new, q_new, sl, cl)
        return (p_new, q_new, p_sum + p_new, q_sum + q_new, sl, cl)

    zero = jnp.zeros((1, 1), f32)
    if dissipate:
        carry = (p0, q0, zero, zero)
    else:
        carry = (p0, q0, p0, q0, zero, zero)   # running sums include the encoder state

    n_pre = layers - 1                          # all but the last layer
    if n_pre <= 8:
        for _ in range(n_pre):                  # fully unrolled for small HGN_LAYERS
            carry = euler_step(carry)
    else:
        carry = lax.fori_loop(0, n_pre, lambda i, cr: euler_step(cr), carry)

    if dissipate:
        p, q, sl, cl = carry
    else:
        p, q, p_sum, q_sum, sl, cl = carry

    # -------- final layer: widen the matmul RHS with q_sq for the energy terms --
    q_sq = jnp.sum(q * q, axis=1, keepdims=True)
    rhs = jnp.concatenate([q, q_sq], axis=1).astype(bf16)             # (N, pq+1)
    fwd = jnp.dot(e, rhs, preferred_element_type=f32)                 # e_sym @ [q | q2]
    eq, es = fwd[:, 0:pq], fwd[:, pq:pq + 1]

    dq = mass * p
    dp = -(0.5 * (deg * q - eq) + (q - c))
    if dissipate:
        dp = dp - fric * p
    dpt = tau_f * dp
    p_new = p + dpt
    q_new = q + tau_f * dq

    diff = dq - p
    sl = sl + jnp.sqrt(jnp.sum(diff * diff))
    mdp = jnp.dot(mnm, dpt, preferred_element_type=f32)
    cl = cl + jnp.sqrt(jnp.sum(mdp * mdp))

    # -------- per-molecule energies from the state ENTERING the last step --------
    p_sq = jnp.sum(p * p, axis=1, keepdims=True)
    kin = 0.5 * mass * p_sq
    qdot_eq = jnp.sum(q * eq, axis=1, keepdims=True)
    pair = 0.125 * (deg * q_sq + es - 2.0 * qdot_eq)
    onsite = 0.5 * jnp.sum((q - c) * (q - c), axis=1, keepdims=True)
    energy = kin + pair + onsite
    diss = 0.5 * fric * p_sq
    # one mnm matmul for both h and d
    hd_ref[...] = jnp.dot(mnm, jnp.concatenate([energy, diss], axis=1),
                          preferred_element_type=f32)

    # -------- final-state + loss outputs (lane-dense packed slabs) ----------------
    if dissipate:
        fp, fq = p_new, q_new
    else:
        inv = jnp.float32(1.0 / (layers + 1))
        fp = (p_sum + p_new) * inv
        fq = (q_sum + q_new) * inv
    pq_out_ref[...] = jnp.concatenate([fp, fq], axis=1)
    loss_ref[...] = jnp.concatenate([sl, cl], axis=1)


# ---------------------------------------------------------------------------
# Wrapper
# ---------------------------------------------------------------------------

def _pad_bytes(rows, cols, bpe):
    # (8, 128)-tile padded footprint (over-estimates bf16 (16,128) tiles: fine)
    return ((rows + 7) // 8) * 8 * ((cols + 127) // 128) * 128 * bpe


def _vmem_limit_bytes(n, m, n_dim, pq):
    need = (2 * _pad_bytes(n, n, 2)                  # e_sym bf16 (+ headroom for its load)
            + _pad_bytes(n, n_dim, 4)                # v
            + _pad_bytes(m, n, 4)                    # mnm
            + _pad_bytes(n, 1, 4)                    # deg
            + _pad_bytes(n_dim, 3 * pq + 2, 4)       # fused W
            + _pad_bytes(1, 3 * pq + 2, 4)           # fused b
            + _pad_bytes(n, 2 * pq, 4)               # packed p|q output
            + _pad_bytes(m, 2, 4) + _pad_bytes(1, 2, 4)
            + 16 * _pad_bytes(n, 128, 4))            # loop-carried values / spills
    limit = max(2 * need, 32 * 1024 * 1024)
    try:
        cap = pltpu.get_tpu_info().vmem_capacity_bytes
        limit = min(limit, int(cap * 3 / 4))         # leave compiler-internal headroom
    except Exception:
        limit = min(limit, 96 * 1024 * 1024)
    return int(limit)


def hamiltonian_position_producer(params, config, v_features, e, mol_node_matrix,
                                  mol_node_mask, return_multi=False):
    """JAX/Pallas equivalent of HamiltonianPositionProducer.forward."""
    # TODO(synk): mol_node_mask unused (submodule source unavailable; per-molecule
    # energies are plain sums via mol_node_matrix).
    # TODO(synk): LSTM=True branch of LstmPQEncoder not reconstructed; linear path used.
    # TODO(synk): original derivation uses autograd of a learned energy net; here the
    # dissipative Hamiltonian is analytic so gradients are closed-form in-kernel.
    if return_multi:
        # TODO(synk): per-layer ps/qs lists are not materialized by the fused kernel.
        raise NotImplementedError("return_multi=True not supported by the fused kernel")

    tau = float(config["TAU"])
    layers = int(config["HGN_LAYERS"])
    dissipate = bool(config["DISSIPATE"])
    assert layers >= 1

    f32 = jnp.float32
    N, n_dim = v_features.shape
    M = mol_node_matrix.shape[0]
    pq = params["Wp"].shape[1]

    # physics only depends on e + e^T: symmetrize once, stream in bf16,
    # keep the (exact) f32 degree vector computed before the cast.
    e_sym = (e + e.T).astype(f32)
    deg = jnp.sum(e_sym, axis=1, keepdims=True)          # deg_r + deg_c of original e
    e_sym_bf16 = e_sym.astype(jnp.bfloat16)

    # fuse the five encoder projections into one [n_dim, 3*pq + 2] weight matrix
    w_all = jnp.concatenate([params["Wp"], params["Wq"], params["Wc"],
                             params["Wm"], params["Wf"]], axis=1)
    b_all = jnp.concatenate([params["bp"], params["bq"], params["bc"],
                             params["bm"], params["bf"]], axis=1)

    kernel = functools.partial(fused_hpp_kernel, tau=tau, layers=layers,
                               dissipate=dissipate, pq=pq)

    inputs = (v_features.astype(f32), e_sym_bf16, deg,
              mol_node_matrix.astype(f32), w_all, b_all)
    out_shapes = (
        jax.ShapeDtypeStruct((N, 2 * pq), f32),   # [final_p | final_q]
        jax.ShapeDtypeStruct((1, 2), f32),        # [s_loss | c_loss]
        jax.ShapeDtypeStruct((M, 2), f32),        # [h | d]
    )

    vmem_spec = pl.BlockSpec(memory_space=pltpu.MemorySpace.VMEM)
    pq_out, losses, hd = pl.pallas_call(
        kernel,
        out_shape=out_shapes,
        in_specs=[vmem_spec] * len(inputs),       # whole-array VMEM residents, no grid
        out_specs=(vmem_spec,) * len(out_shapes),
        compiler_params=pltpu.CompilerParams(
            vmem_limit_bytes=_vmem_limit_bytes(N, M, n_dim, pq),
        ),
    )(*inputs)

    final_p = pq_out[:, 0:pq]
    final_q = pq_out[:, pq:2 * pq]
    s_loss = losses[0, 0]
    c_loss = losses[0, 1]
    h = hd[:, 0:1]
    d = hd[:, 1:2]
    return final_p, final_q, s_loss, c_loss, h, d


# ---------------------------------------------------------------------------
# Parameter construction + demo
# ---------------------------------------------------------------------------

def init_params(key, n_dim, pq_dim):
    ks = jax.random.split(key, 6)
    s = 0.1
    f32 = jnp.float32
    return {
        "Wp": s * jax.random.normal(ks[0], (n_dim, pq_dim), f32),
        "bp": jnp.zeros((1, pq_dim), f32),
        "Wq": s * jax.random.normal(ks[1], (n_dim, pq_dim), f32),
        "bq": jnp.zeros((1, pq_dim), f32),
        "Wm": s * jax.random.normal(ks[2], (n_dim, 1), f32),
        "bm": jnp.zeros((1, 1), f32),
        "Wf": s * jax.random.normal(ks[3], (n_dim, 1), f32),
        "bf": jnp.zeros((1, 1), f32),
        "Wc": s * jax.random.normal(ks[4], (n_dim, pq_dim), f32),
        "bc": jnp.zeros((1, pq_dim), f32),
    }


if __name__ == "__main__":
    # small synthetic problem: 4 molecules x 4 nodes = 16 nodes
    N, M, n_dim, pq_dim = 16, 4, 16, 8
    config = {
        "PQ_DIM": pq_dim,
        "HGN_LAYERS": 4,
        "TAU": 0.25,
        "DROPOUT": 0.0,
        "DISSIPATE": True,
        "DISTURB": False,
        "LSTM": False,
    }

    key = jax.random.PRNGKey(0)
    k_par, k_v, k_e = jax.random.split(key, 3)

    params = init_params(k_par, n_dim, pq_dim)

    v_features = jax.random.normal(k_v, (N, n_dim), jnp.float32)
    e = jax.random.uniform(k_e, (N, N), jnp.float32)
    e = 0.5 * (e + e.T)                       # symmetric non-negative edge weights
    mol_id = jnp.arange(N) // (N // M)        # node -> molecule assignment
    mol_node_matrix = (mol_id[None, :] == jnp.arange(M)[:, None]).astype(jnp.float32)
    mol_node_mask = mol_node_matrix

    # dissipative path (final state = last layer)
    final_p, final_q, s_loss, c_loss, h, d = hamiltonian_position_producer(
        params, config, v_features, e, mol_node_matrix, mol_node_mask)
    jax.block_until_ready((final_p, final_q, s_loss, c_loss, h, d))

    assert final_p.shape == (N, pq_dim) and final_q.shape == (N, pq_dim)
    assert h.shape == (M, 1) and d.shape == (M, 1)
    assert bool(jnp.isfinite(s_loss)) and bool(jnp.isfinite(c_loss))
    assert bool(jnp.all(jnp.isfinite(final_p))) and bool(jnp.all(jnp.isfinite(final_q)))
    assert bool(jnp.all(jnp.isfinite(h))) and bool(jnp.all(jnp.isfinite(d)))

    # non-dissipative path (final state = average over all layer states)
    config_nd = dict(config, DISSIPATE=False)
    fp2, fq2, sl2, cl2, h2, d2 = hamiltonian_position_producer(
        params, config_nd, v_features, e, mol_node_matrix, mol_node_mask)
    jax.block_until_ready((fp2, fq2, sl2, cl2, h2, d2))

    assert fp2.shape == (N, pq_dim) and fq2.shape == (N, pq_dim)
    assert bool(jnp.all(jnp.isfinite(fp2))) and bool(jnp.all(jnp.isfinite(fq2)))
    assert bool(jnp.isfinite(sl2)) and bool(jnp.isfinite(cl2))

    print("KERNEL_OK")
</pallas_src>

<mosaic_0001>
module attributes {stable_mosaic.version = 11 : i64} {
  func.func @fused_hpp_kernel(%arg0: memref<16x16xf32, #tpu.memory_space<vmem>>, %arg1: memref<16x16xbf16, #tpu.memory_space<vmem>>, %arg2: memref<16x1xf32, #tpu.memory_space<vmem>>, %arg3: memref<4x16xf32, #tpu.memory_space<vmem>>, %arg4: memref<16x26xf32, #tpu.memory_space<vmem>>, %arg5: memref<1x26xf32, #tpu.memory_space<vmem>>, %arg6: memref<16x16xf32, #tpu.memory_space<vmem>>, %arg7: memref<1x2xf32, #tpu.memory_space<vmem>>, %arg8: memref<4x2xf32, #tpu.memory_space<vmem>>) attributes {dimension_semantics = [], scalar_prefetch = 0 : i64, scratch_operands = 0 : i64, tpu.core_type = #tpu.core_type<tc>} {
    %c0 = arith.constant 0 : index
    %c0_0 = arith.constant 0 : index
    %0 = vector.load %arg1[%c0, %c0_0] : memref<16x16xbf16, #tpu.memory_space<vmem>>, vector<16x16xbf16>
    %c0_1 = arith.constant 0 : index
    %c0_2 = arith.constant 0 : index
    %1 = vector.load %arg2[%c0_1, %c0_2] : memref<16x1xf32, #tpu.memory_space<vmem>>, vector<16x1xf32>
    %c0_3 = arith.constant 0 : index
    %c0_4 = arith.constant 0 : index
    %2 = vector.load %arg3[%c0_3, %c0_4] : memref<4x16xf32, #tpu.memory_space<vmem>>, vector<4x16xf32>
    %c0_5 = arith.constant 0 : index
    %c0_6 = arith.constant 0 : index
    %3 = vector.load %arg0[%c0_5, %c0_6] : memref<16x16xf32, #tpu.memory_space<vmem>>, vector<16x16xf32>
    %c0_7 = arith.constant 0 : index
    %c0_8 = arith.constant 0 : index
    %4 = vector.load %arg4[%c0_7, %c0_8] : memref<16x26xf32, #tpu.memory_space<vmem>>, vector<16x26xf32>
    %cst = arith.constant dense<0.000000e+00> : vector<16x26xf32>
    %5 = tpu.matmul %3, %4, %cst {dimension_numbers = #tpu.dot_dimension_numbers<[1], [0], [0], [1], [0, 0, 1, 1], [], []>} : vector<16x16xf32>, vector<16x26xf32>, vector<16x26xf32> -> vector<16x26xf32>
    %c0_9 = arith.constant 0 : index
    %c0_10 = arith.constant 0 : index
    %6 = vector.load %arg5[%c0_9, %c0_10] : memref<1x26xf32, #tpu.memory_space<vmem>>, vector<1x26xf32>
    %7 = vector.broadcast %6 : vector<1x26xf32> to vector<16x26xf32>
    %8 = arith.addf %5, %7 : vector<16x26xf32>
    %9 = vector.extract_strided_slice %8 {offsets = [0, 0], sizes = [16, 8], strides = [1, 1]} : vector<16x26xf32> to vector<16x8xf32>
    %10 = vector.extract_strided_slice %8 {offsets = [0, 8], sizes = [16, 8], strides = [1, 1]} : vector<16x26xf32> to vector<16x8xf32>
    %11 = vector.extract_strided_slice %8 {offsets = [0, 16], sizes = [16, 8], strides = [1, 1]} : vector<16x26xf32> to vector<16x8xf32>
    %12 = vector.extract_strided_slice %8 {offsets = [0, 24], sizes = [16, 1], strides = [1, 1]} : vector<16x26xf32> to vector<16x1xf32>
    %13 = vector.extract_strided_slice %8 {offsets = [0, 25], sizes = [16, 1], strides = [1, 1]} : vector<16x26xf32> to vector<16x1xf32>
    %14 = math.absf %12 : vector<16x1xf32>
    %cst_11 = arith.constant 0.000000e+00 : f32
    %15 = vector.broadcast %cst_11 : f32 to vector<16x1xf32>
    %16 = arith.subf %15, %14 : vector<16x1xf32>
    %17 = math.exp %16 : vector<16x1xf32>
    %cst_12 = arith.constant 1.000000e+00 : f32
    %18 = vector.broadcast %cst_12 : f32 to vector<16x1xf32>
    %19 = arith.addf %18, %17 : vector<16x1xf32>
    %20 = math.log %19 : vector<16x1xf32>
    %cst_13 = arith.constant 0.000000e+00 : f32
    %21 = vector.broadcast %cst_13 : f32 to vector<16x1xf32>
    %22 = arith.maximumf %12, %21 : vector<16x1xf32>
    %23 = arith.addf %20, %22 : vector<16x1xf32>
    %cst_14 = arith.constant 0.000000e+00 : f32
    %24 = vector.broadcast %cst_14 : f32 to vector<16x1xf32>
    %25 = arith.subf %24, %13 : vector<16x1xf32>
    %26 = math.exp %25 : vector<16x1xf32>
    %cst_15 = arith.constant 1.000000e+00 : f32
    %27 = vector.broadcast %cst_15 : f32 to vector<16x1xf32>
    %28 = arith.addf %27, %26 : vector<16x1xf32>
    %cst_16 = arith.constant 1.000000e+00 : f32
    %29 = vector.broadcast %cst_16 : f32 to vector<16x1xf32>
    %30 = arith.divf %29, %28 : vector<16x1xf32>
    %cst_17 = arith.constant 0.000000e+00 : f32
    %31 = vector.broadcast %cst_17 : f32 to vector<1x1xf32>
    %32 = arith.truncf %10 : vector<16x8xf32> to vector<16x8xbf16>
    %cst_18 = arith.constant dense<0.000000e+00> : vector<16x8xf32>
    %33 = tpu.matmul %0, %32, %cst_18 {dimension_numbers = #tpu.dot_dimension_numbers<[1], [0], [0], [1], [0, 0, 1, 1], [], []>} : vector<16x16xbf16>, vector<16x8xbf16>, vector<16x8xf32> -> vector<16x8xf32>
    %34 = vector.broadcast %23 : vector<16x1xf32> to vector<16x8xf32>
    %35 = arith.mulf %34, %9 : vector<16x8xf32>
    %36 = vector.broadcast %1 : vector<16x1xf32> to vector<16x8xf32>
    %37 = arith.mulf %36, %10 : vector<16x8xf32>
    %38 = arith.subf %37, %33 : vector<16x8xf32>
    %cst_19 = arith.constant 5.000000e-01 : f32
    %39 = vector.broadcast %cst_19 : f32 to vector<16x8xf32>
    %40 = arith.mulf %39, %38 : vector<16x8xf32>
    %41 = arith.subf %10, %11 : vector<16x8xf32>
    %42 = arith.addf %40, %41 : vector<16x8xf32>
    %cst_20 = arith.constant 0.000000e+00 : f32
    %43 = vector.broadcast %cst_20 : f32 to vector<16x8xf32>
    %44 = arith.subf %43, %42 : vector<16x8xf32>
    %45 = vector.broadcast %30 : vector<16x1xf32> to vector<16x8xf32>
    %46 = arith.mulf %45, %9 : vector<16x8xf32>
    %47 = arith.subf %44, %46 : vector<16x8xf32>
    %cst_21 = arith.constant 2.500000e-01 : f32
    %48 = vector.broadcast %cst_21 : f32 to vector<16x8xf32>
    %49 = arith.mulf %48, %47 : vector<16x8xf32>
    %50 = arith.addf %9, %49 : vector<16x8xf32>
    %cst_22 = arith.constant 2.500000e-01 : f32
    %51 = vector.broadcast %cst_22 : f32 to vector<16x8xf32>
    %52 = arith.mulf %51, %35 : vector<16x8xf32>
    %53 = arith.addf %10, %52 : vector<16x8xf32>
    %54 = arith.subf %35, %9 : vector<16x8xf32>
    %55 = arith.mulf %54, %54 : vector<16x8xf32>
    %56 = vector.shape_cast %55 : vector<16x8xf32> to vector<1x16x8xf32>
    %cst_23 = arith.constant dense<0.000000e+00> : vector<1xf32>
    %57 = vector.multi_reduction <add>, %56, %cst_23 [1, 2] : vector<1x16x8xf32> to vector<1xf32>
    %58 = vector.shape_cast %57 : vector<1xf32> to vector<1x1x1xf32>
    %59 = vector.extract %58[0, 0, 0] : f32 from vector<1x1x1xf32>
    %60 = math.sqrt %59 : f32
    %61 = vector.broadcast %60 : f32 to vector<1x1xf32>
    %62 = arith.addf %31, %61 : vector<1x1xf32>
    %cst_24 = arith.constant dense<0.000000e+00> : vector<4x8xf32>
    %63 = tpu.matmul %2, %49, %cst_24 {dimension_numbers = #tpu.dot_dimension_numbers<[1], [0], [0], [1], [0, 0, 1, 1], [], []>} : vector<4x16xf32>, vector<16x8xf32>, vector<4x8xf32> -> vector<4x8xf32>
    %64 = arith.mulf %63, %63 : vector<4x8xf32>
    %65 = vector.shape_cast %64 : vector<4x8xf32> to vector<1x4x8xf32>
    %cst_25 = arith.constant dense<0.000000e+00> : vector<1xf32>
    %66 = vector.multi_reduction <add>, %65, %cst_25 [1, 2] : vector<1x4x8xf32> to vector<1xf32>
    %67 = vector.shape_cast %66 : vector<1xf32> to vector<1x1x1xf32>
    %68 = vector.extract %67[0, 0, 0] : f32 from vector<1x1x1xf32>
    %69 = math.sqrt %68 : f32
    %70 = vector.broadcast %69 : f32 to vector<1x1xf32>
    %71 = arith.addf %31, %70 : vector<1x1xf32>
    %72 = arith.truncf %53 : vector<16x8xf32> to vector<16x8xbf16>
    %cst_26 = arith.constant dense<0.000000e+00> : vector<16x8xf32>
    %73 = tpu.matmul %0, %72, %cst_26 {dimension_numbers = #tpu.dot_dimension_numbers<[1], [0], [0], [1], [0, 0, 1, 1], [], []>} : vector<16x16xbf16>, vector<16x8xbf16>, vector<16x8xf32> -> vector<16x8xf32>
    %74 = vector.broadcast %23 : vector<16x1xf32> to vector<16x8xf32>
    %75 = arith.mulf %74, %50 : vector<16x8xf32>
    %76 = vector.broadcast %1 : vector<16x1xf32> to vector<16x8xf32>
    %77 = arith.mulf %76, %53 : vector<16x8xf32>
    %78 = arith.subf %77, %73 : vector<16x8xf32>
    %cst_27 = arith.constant 5.000000e-01 : f32
    %79 = vector.broadcast %cst_27 : f32 to vector<16x8xf32>
    %80 = arith.mulf %79, %78 : vector<16x8xf32>
    %81 = arith.subf %53, %11 : vector<16x8xf32>
    %82 = arith.addf %80, %81 : vector<16x8xf32>
    %cst_28 = arith.constant 0.000000e+00 : f32
    %83 = vector.broadcast %cst_28 : f32 to vector<16x8xf32>
    %84 = arith.subf %83, %82 : vector<16x8xf32>
    %85 = vector.broadcast %30 : vector<16x1xf32> to vector<16x8xf32>
    %86 = arith.mulf %85, %50 : vector<16x8xf32>
    %87 = arith.subf %84, %86 : vector<16x8xf32>
    %cst_29 = arith.constant 2.500000e-01 : f32
    %88 = vector.broadcast %cst_29 : f32 to vector<16x8xf32>
    %89 = arith.mulf %88, %87 : vector<16x8xf32>
    %90 = arith.addf %50, %89 : vector<16x8xf32>
    %cst_30 = arith.constant 2.500000e-01 : f32
    %91 = vector.broadcast %cst_30 : f32 to vector<16x8xf32>
    %92 = arith.mulf %91, %75 : vector<16x8xf32>
    %93 = arith.addf %53, %92 : vector<16x8xf32>
    %94 = arith.subf %75, %50 : vector<16x8xf32>
    %95 = arith.mulf %94, %94 : vector<16x8xf32>
    %96 = vector.shape_cast %95 : vector<16x8xf32> to vector<1x16x8xf32>
    %cst_31 = arith.constant dense<0.000000e+00> : vector<1xf32>
    %97 = vector.multi_reduction <add>, %96, %cst_31 [1, 2] : vector<1x16x8xf32> to vector<1xf32>
    %98 = vector.shape_cast %97 : vector<1xf32> to vector<1x1x1xf32>
    %99 = vector.extract %98[0, 0, 0] : f32 from vector<1x1x1xf32>
    %100 = math.sqrt %99 : f32
    %101 = vector.broadcast %100 : f32 to vector<1x1xf32>
    %102 = arith.addf %62, %101 : vector<1x1xf32>
    %cst_32 = arith.constant dense<0.000000e+00> : vector<4x8xf32>
    %103 = tpu.matmul %2, %89, %cst_32 {dimension_numbers = #tpu.dot_dimension_numbers<[1], [0], [0], [1], [0, 0, 1, 1], [], []>} : vector<4x16xf32>, vector<16x8xf32>, vector<4x8xf32> -> vector<4x8xf32>
    %104 = arith.mulf %103, %103 : vector<4x8xf32>
    %105 = vector.shape_cast %104 : vector<4x8xf32> to vector<1x4x8xf32>
    %cst_33 = arith.constant dense<0.000000e+00> : vector<1xf32>
    %106 = vector.multi_reduction <add>, %105, %cst_33 [1, 2] : vector<1x4x8xf32> to vector<1xf32>
    %107 = vector.shape_cast %106 : vector<1xf32> to vector<1x1x1xf32>
    %108 = vector.extract %107[0, 0, 0] : f32 from vector<1x1x1xf32>
    %109 = math.sqrt %108 : f32
    %110 = vector.broadcast %109 : f32 to vector<1x1xf32>
    %111 = arith.addf %71, %110 : vector<1x1xf32>
    %112 = arith.truncf %93 : vector<16x8xf32> to vector<16x8xbf16>
    %cst_34 = arith.constant dense<0.000000e+00> : vector<16x8xf32>
    %113 = tpu.matmul %0, %112, %cst_34 {dimension_numbers = #tpu.dot_dimension_numbers<[1], [0], [0], [1], [0, 0, 1, 1], [], []>} : vector<16x16xbf16>, vector<16x8xbf16>, vector<16x8xf32> -> vector<16x8xf32>
    %114 = vector.broadcast %23 : vector<16x1xf32> to vector<16x8xf32>
    %115 = arith.mulf %114, %90 : vector<16x8xf32>
    %116 = vector.broadcast %1 : vector<16x1xf32> to vector<16x8xf32>
    %117 = arith.mulf %116, %93 : vector<16x8xf32>
    %118 = arith.subf %117, %113 : vector<16x8xf32>
    %cst_35 = arith.constant 5.000000e-01 : f32
    %119 = vector.broadcast %cst_35 : f32 to vector<16x8xf32>
    %120 = arith.mulf %119, %118 : vector<16x8xf32>
    %121 = arith.subf %93, %11 : vector<16x8xf32>
    %122 = arith.addf %120, %121 : vector<16x8xf32>
    %cst_36 = arith.constant 0.000000e+00 : f32
    %123 = vector.broadcast %cst_36 : f32 to vector<16x8xf32>
    %124 = arith.subf %123, %122 : vector<16x8xf32>
    %125 = vector.broadcast %30 : vector<16x1xf32> to vector<16x8xf32>
    %126 = arith.mulf %125, %90 : vector<16x8xf32>
    %127 = arith.subf %124, %126 : vector<16x8xf32>
    %cst_37 = arith.constant 2.500000e-01 : f32
    %128 = vector.broadcast %cst_37 : f32 to vector<16x8xf32>
    %129 = arith.mulf %128, %127 : vector<16x8xf32>
    %130 = arith.addf %90, %129 : vector<16x8xf32>
    %cst_38 = arith.constant 2.500000e-01 : f32
    %131 = vector.broadcast %cst_38 : f32 to vector<16x8xf32>
    %132 = arith.mulf %131, %115 : vector<16x8xf32>
    %133 = arith.addf %93, %132 : vector<16x8xf32>
    %134 = arith.subf %115, %90 : vector<16x8xf32>
    %135 = arith.mulf %134, %134 : vector<16x8xf32>
    %136 = vector.shape_cast %135 : vector<16x8xf32> to vector<1x16x8xf32>
    %cst_39 = arith.constant dense<0.000000e+00> : vector<1xf32>
    %137 = vector.multi_reduction <add>, %136, %cst_39 [1, 2] : vector<1x16x8xf32> to vector<1xf32>
    %138 = vector.shape_cast %137 : vector<1xf32> to vector<1x1x1xf32>
    %139 = vector.extract %138[0, 0, 0] : f32 from vector<1x1x1xf32>
    %140 = math.sqrt %139 : f32
    %141 = vector.broadcast %140 : f32 to vector<1x1xf32>
    %142 = arith.addf %102, %141 : vector<1x1xf32>
    %cst_40 = arith.constant dense<0.000000e+00> : vector<4x8xf32>
    %143 = tpu.matmul %2, %129, %cst_40 {dimension_numbers = #tpu.dot_dimension_numbers<[1], [0], [0], [1], [0, 0, 1, 1], [], []>} : vector<4x16xf32>, vector<16x8xf32>, vector<4x8xf32> -> vector<4x8xf32>
    %144 = arith.mulf %143, %143 : vector<4x8xf32>
    %145 = vector.shape_cast %144 : vector<4x8xf32> to vector<1x4x8xf32>
    %cst_41 = arith.constant dense<0.000000e+00> : vector<1xf32>
    %146 = vector.multi_reduction <add>, %145, %cst_41 [1, 2] : vector<1x4x8xf32> to vector<1xf32>
    %147 = vector.shape_cast %146 : vector<1xf32> to vector<1x1x1xf32>
    %148 = vector.extract %147[0, 0, 0] : f32 from vector<1x1x1xf32>
    %149 = math.sqrt %148 : f32
    %150 = vector.broadcast %149 : f32 to vector<1x1xf32>
    %151 = arith.addf %111, %150 : vector<1x1xf32>
    %152 = arith.mulf %133, %133 : vector<16x8xf32>
    %cst_42 = arith.constant dense<0.000000e+00> : vector<16xf32>
    %153 = vector.multi_reduction <add>, %152, %cst_42 [1] : vector<16x8xf32> to vector<16xf32>
    %154 = vector.shape_cast %153 : vector<16xf32> to vector<16x1xf32>
    %155 = tpu.concatenate %133, %154 in 1 : vector<16x8xf32>, vector<16x1xf32> -> vector<16x9xf32>
    %156 = arith.truncf %155 : vector<16x9xf32> to vector<16x9xbf16>
    %cst_43 = arith.constant dense<0.000000e+00> : vector<16x9xf32>
    %157 = tpu.matmul %0, %156, %cst_43 {dimension_numbers = #tpu.dot_dimension_numbers<[1], [0], [0], [1], [0, 0, 1, 1], [], []>} : vector<16x16xbf16>, vector<16x9xbf16>, vector<16x9xf32> -> vector<16x9xf32>
    %158 = vector.extract_strided_slice %157 {offsets = [0, 0], sizes = [16, 8], strides = [1, 1]} : vector<16x9xf32> to vector<16x8xf32>
    %159 = vector.extract_strided_slice %157 {offsets = [0, 8], sizes = [16, 1], strides = [1, 1]} : vector<16x9xf32> to vector<16x1xf32>
    %160 = vector.broadcast %23 : vector<16x1xf32> to vector<16x8xf32>
    %161 = arith.mulf %160, %130 : vector<16x8xf32>
    %162 = vector.broadcast %1 : vector<16x1xf32> to vector<16x8xf32>
    %163 = arith.mulf %162, %133 : vector<16x8xf32>
    %164 = arith.subf %163, %158 : vector<16x8xf32>
    %cst_44 = arith.constant 5.000000e-01 : f32
    %165 = vector.broadcast %cst_44 : f32 to vector<16x8xf32>
    %166 = arith.mulf %165, %164 : vector<16x8xf32>
    %167 = arith.subf %133, %11 : vector<16x8xf32>
    %168 = arith.addf %166, %167 : vector<16x8xf32>
    %cst_45 = arith.constant 0.000000e+00 : f32
    %169 = vector.broadcast %cst_45 : f32 to vector<16x8xf32>
    %170 = arith.subf %169, %168 : vector<16x8xf32>
    %171 = vector.broadcast %30 : vector<16x1xf32> to vector<16x8xf32>
    %172 = arith.mulf %171, %130 : vector<16x8xf32>
    %173 = arith.subf %170, %172 : vector<16x8xf32>
    %cst_46 = arith.constant 2.500000e-01 : f32
    %174 = vector.broadcast %cst_46 : f32 to vector<16x8xf32>
    %175 = arith.mulf %174, %173 : vector<16x8xf32>
    %176 = arith.addf %130, %175 : vector<16x8xf32>
    %cst_47 = arith.constant 2.500000e-01 : f32
    %177 = vector.broadcast %cst_47 : f32 to vector<16x8xf32>
    %178 = arith.mulf %177, %161 : vector<16x8xf32>
    %179 = arith.addf %133, %178 : vector<16x8xf32>
    %180 = arith.subf %161, %130 : vector<16x8xf32>
    %181 = arith.mulf %180, %180 : vector<16x8xf32>
    %182 = vector.shape_cast %181 : vector<16x8xf32> to vector<1x16x8xf32>
    %cst_48 = arith.constant dense<0.000000e+00> : vector<1xf32>
    %183 = vector.multi_reduction <add>, %182, %cst_48 [1, 2] : vector<1x16x8xf32> to vector<1xf32>
    %184 = vector.shape_cast %183 : vector<1xf32> to vector<1x1x1xf32>
    %185 = vector.extract %184[0, 0, 0] : f32 from vector<1x1x1xf32>
    %186 = math.sqrt %185 : f32
    %187 = vector.broadcast %186 : f32 to vector<1x1xf32>
    %188 = arith.addf %142, %187 : vector<1x1xf32>
    %cst_49 = arith.constant dense<0.000000e+00> : vector<4x8xf32>
    %189 = tpu.matmul %2, %175, %cst_49 {dimension_numbers = #tpu.dot_dimension_numbers<[1], [0], [0], [1], [0, 0, 1, 1], [], []>} : vector<4x16xf32>, vector<16x8xf32>, vector<4x8xf32> -> vector<4x8xf32>
    %190 = arith.mulf %189, %189 : vector<4x8xf32>
    %191 = vector.shape_cast %190 : vector<4x8xf32> to vector<1x4x8xf32>
    %cst_50 = arith.constant dense<0.000000e+00> : vector<1xf32>
    %192 = vector.multi_reduction <add>, %191, %cst_50 [1, 2] : vector<1x4x8xf32> to vector<1xf32>
    %193 = vector.shape_cast %192 : vector<1xf32> to vector<1x1x1xf32>
    %194 = vector.extract %193[0, 0, 0] : f32 from vector<1x1x1xf32>
    %195 = math.sqrt %194 : f32
    %196 = vector.broadcast %195 : f32 to vector<1x1xf32>
    %197 = arith.addf %151, %196 : vector<1x1xf32>
    %198 = arith.mulf %130, %130 : vector<16x8xf32>
    %cst_51 = arith.constant dense<0.000000e+00> : vector<16xf32>
    %199 = vector.multi_reduction <add>, %198, %cst_51 [1] : vector<16x8xf32> to vector<16xf32>
    %200 = vector.shape_cast %199 : vector<16xf32> to vector<16x1xf32>
    %cst_52 = arith.constant 5.000000e-01 : f32
    %201 = vector.broadcast %cst_52 : f32 to vector<16x1xf32>
    %202 = arith.mulf %201, %23 : vector<16x1xf32>
    %203 = arith.mulf %202, %200 : vector<16x1xf32>
    %204 = arith.mulf %133, %158 : vector<16x8xf32>
    %cst_53 = arith.constant dense<0.000000e+00> : vector<16xf32>
    %205 = vector.multi_reduction <add>, %204, %cst_53 [1] : vector<16x8xf32> to vector<16xf32>
    %206 = vector.shape_cast %205 : vector<16xf32> to vector<16x1xf32>
    %207 = arith.mulf %1, %154 : vector<16x1xf32>
    %208 = arith.addf %207, %159 : vector<16x1xf32>
    %cst_54 = arith.constant 2.000000e+00 : f32
    %209 = vector.broadcast %cst_54 : f32 to vector<16x1xf32>
    %210 = arith.mulf %209, %206 : vector<16x1xf32>
    %211 = arith.subf %208, %210 : vector<16x1xf32>
    %cst_55 = arith.constant 1.250000e-01 : f32
    %212 = vector.broadcast %cst_55 : f32 to vector<16x1xf32>
    %213 = arith.mulf %212, %211 : vector<16x1xf32>
    %214 = arith.subf %133, %11 : vector<16x8xf32>
    %215 = arith.subf %133, %11 : vector<16x8xf32>
    %216 = arith.mulf %214, %215 : vector<16x8xf32>
    %cst_56 = arith.constant dense<0.000000e+00> : vector<16xf32>
    %217 = vector.multi_reduction <add>, %216, %cst_56 [1] : vector<16x8xf32> to vector<16xf32>
    %218 = vector.shape_cast %217 : vector<16xf32> to vector<16x1xf32>
    %cst_57 = arith.constant 5.000000e-01 : f32
    %219 = vector.broadcast %cst_57 : f32 to vector<16x1xf32>
    %220 = arith.mulf %219, %218 : vector<16x1xf32>
    %221 = arith.addf %203, %213 : vector<16x1xf32>
    %222 = arith.addf %221, %220 : vector<16x1xf32>
    %cst_58 = arith.constant 5.000000e-01 : f32
    %223 = vector.broadcast %cst_58 : f32 to vector<16x1xf32>
    %224 = arith.mulf %223, %30 : vector<16x1xf32>
    %225 = arith.mulf %224, %200 : vector<16x1xf32>
    %226 = tpu.concatenate %222, %225 in 1 : vector<16x1xf32>, vector<16x1xf32> -> vector<16x2xf32>
    %cst_59 = arith.constant dense<0.000000e+00> : vector<4x2xf32>
    %227 = tpu.matmul %2, %226, %cst_59 {dimension_numbers = #tpu.dot_dimension_numbers<[1], [0], [0], [1], [0, 0, 1, 1], [], []>} : vector<4x16xf32>, vector<16x2xf32>, vector<4x2xf32> -> vector<4x2xf32>
    %c0_60 = arith.constant 0 : index
    %c0_61 = arith.constant 0 : index
    %228 = vector.load %arg8[%c0_60, %c0_61] : memref<4x2xf32, #tpu.memory_space<vmem>>, vector<4x2xf32>
    tpu.vector_store %arg8[%c0_60, %c0_61], %227 {strides = array<i32>} : memref<4x2xf32, #tpu.memory_space<vmem>>, vector<4x2xf32>,
    %229 = tpu.concatenate %176, %179 in 1 : vector<16x8xf32>, vector<16x8xf32> -> vector<16x16xf32>
    %c0_62 = arith.constant 0 : index
    %c0_63 = arith.constant 0 : index
    %230 = vector.load %arg6[%c0_62, %c0_63] : memref<16x16xf32, #tpu.memory_space<vmem>>, vector<16x16xf32>
    tpu.vector_store %arg6[%c0_62, %c0_63], %229 {strides = array<i32>} : memref<16x16xf32, #tpu.memory_space<vmem>>, vector<16x16xf32>,
    %231 = tpu.concatenate %188, %197 in 1 : vector<1x1xf32>, vector<1x1xf32> -> vector<1x2xf32>
    %c0_64 = arith.constant 0 : index
    %c0_65 = arith.constant 0 : index
    %232 = vector.load %arg7[%c0_64, %c0_65] : memref<1x2xf32, #tpu.memory_space<vmem>>, vector<1x2xf32>
    tpu.vector_store %arg7[%c0_64, %c0_65], %231 {strides = array<i32>} : memref<1x2xf32, #tpu.memory_space<vmem>>, vector<1x2xf32>,
    return
  }
}

</mosaic_0001>

<bundles_post_ra>
// kernel: tpu_custom_call.1
= control target key start
LH: loop header
LB: loop body
LE: loop exit
PB: predicated region body
PF: predicated region fallthrough
CT: control target
= control target key end

     0   :  { %14 = vsyncpa [#allocation3], 0  ;;  %s2131_s0 = inlined_call_operand.vmem [shape: f32[16,16], index: 0, kind: input, shape index: {}]   ;;  %s2132_s1 = inlined_call_operand.hbm [shape: bf16[16,16], index: 1, kind: input, shape index: {}]   ;;  %s2133_s2 = inlined_call_operand.vmem [shape: f32[16,1], index: 2, kind: input, shape index: {}]   ;;  %s2134_s3 = inlined_call_operand.vmem [shape: f32[4,16], index: 3, kind: input, shape index: {}]   ;;  %s2135_s4 = inlined_call_operand.hbm [shape: f32[16,26], index: 4, kind: input, shape index: {}]   ;;  %s2136_s5 = inlined_call_operand.vmem [shape: f32[1,26], index: 5, kind: input, shape index: {}]   ;;  %s2137_s6 = inlined_call_operand.hbm [shape: f32[16,16], index: 6, kind: output, shape index: {0}]   ;;  %s2138_s7 = inlined_call_operand.hbm [shape: f32[1,2], index: 7, kind: output, shape index: {1}]   ;;  %s2139_s8 = inlined_call_operand.vmem [shape: f32[4,2], index: 8, kind: output, shape index: {2}]  }
   0x1   :  { %15 = vsyncpa [#allocation6], 0 }
   0x2   :  { %16 = vsyncpa [#allocation4], 0 }
   0x3   :  { %17 = vsyncpa [#allocation9], 0  ;;  %s1648_s27 = smov [#allocation2]  }
   0x4   :  { %s25_s28 = sshll.u32 %s1648_s27, 4  ;;  %s26_s28 = int_to_ptr.vmem [resolvable:$true] %s25_s28 }
   0x5   :  { %s1568_s29 = scalar_lea.vmem %s26_s28, 128  ;;  %p1573_p1 = scmp.lt.s32.totalorder %s26_s28, %s26_s28 }
   0x6   :  { %p1569_p0 = scmp.ne.s32.totalorder %s26_s28, %s1568_s29  ;;  %p1574_p2 = scmp.lt.s32.totalorder %s1568_s29, %s1568_s29 }
   0x8   :  { %p1575_p3 = por %p1574_p2, %p1573_p1 }
   0xa   :  { %p1576_p4 = pnand %p1575_p3, %p1569_p0 }
   0xc   :  { %1579 = shalt.err (!%p1576_p4)
}
   0xd   :  { %s1649_s30 = smov 64   ;;  %s1650_s9 = smov 4  }
   0xe   :  { %31 = dma.hbm_to_vmem [thread:$0]  %s2132_s1, 128, %s26_s28, [#allocation3], %s1649_s30, %s1649_s30, %s1650_s9  }
   0xf   :  { %s1651_s12 = smov [#allocation5]  }
  0x10   :  { %s41_s13 = sshll.u32 %s1651_s12, 4  ;;  %s42_s13 = int_to_ptr.vmem [resolvable:$true] %s41_s13 }
  0x11   :  { %s1588_s14 = scalar_lea.vmem %s42_s13, 256  ;;  %p1593_p6 = scmp.lt.s32.totalorder %s42_s13, %s42_s13 }
  0x12   :  { %p1589_p5 = scmp.ne.s32.totalorder %s42_s13, %s1588_s14  ;;  %p1594_p7 = scmp.lt.s32.totalorder %s1588_s14, %s1588_s14 }
  0x14   :  { %p1595_p8 = por %p1594_p7, %p1593_p6 }
  0x16   :  { %p1596_p9 = pnand %p1595_p8, %p1589_p5 }
  0x18   :  { %1599 = shalt.err (!%p1596_p9)
}
  0x19   :  { %s1652_s15 = smov 128   ;;  %s1653_s16 = smov 8  }
  0x1a   :  { %47 = dma.hbm_to_vmem [thread:$0]  %s2135_s4, 256, %s42_s13, [#allocation6], %s1652_s15, %s1652_s15, %s1653_s16  }
  0x1b   :  { %1640 = dma.done.wait [#allocation3], 128  }
  0x1c   :  { %1641 = vsyncadd [#allocation3], 4294967168 }
  0x1d   :  { %1642 = dma.done.wait [#allocation6], 256  }
  0x1e   :  { %1643 = vsyncadd [#allocation6], 4294967040  ;;  %vm73_vm0 = vcmask 130048   ;;  %v65_v0 = vld [vmem:[#allocation5 + $0x8] sm:$0xff]  ;;  %v64_v1 = vld [vmem:[#allocation5] sm:$0xff]  ;;  %v1654_v4 = vmov 25  }
  0x1f   :  { %v62_v2 = vld [vmem:[%s2131_s0] sm:$0xff]  ;;  %1402 = vmatprep.subr.mxu0 %v65_v0  ;;  %v63_v3 = vld [vmem:[%s2131_s0 + $0x8] sm:$0xff]  ;;  %1516 = vset.pattern.permute.xlu0 %v1654_v4  ;;  %v1655_v5 = vmov 24   ;;  %v1656_v6 = vmov 0.0   ;;  %vm1657_vm1 = vmmov 0   ;;  %s1658_s22 = smov 120  }
  0x20   :  { %1406 = vmatprep.mubr.msk.f32.mxu0 %vm73_vm0, %v62_v2  ;;  %1403 = vmatpush3.msra.mxu0 %v65_v0  ;;  %v1362_v7 = vld [vmem:[%s2136_s5] ss:$0 sm:$0xff]  ;;  %v1752_v33 = vld [vmem:[%s2133_s2 + $0x8] sm:$0xff]  ;;  %v1659_v37 = vmov 0   ;;  %vm339_vm2 = vcmask 64512   ;;  %vm437_vm3 = vcmask 60416  }
  0x21   :  { %1404 = vmatprep.subr.mxu0 %v64_v1  ;;  %1517 = vset.pattern.permute.xlu1 %v1655_v5  ;;  %v1769_v43 = vld [vmem:[%s2133_s2] sm:$0xff]  ;;  %s1660_s13 = smov 24   ;;  %s1661_s14 = smov 104  }
  0x22   :  { %1405 = vmatpush3.msra.mxu0 %v64_v1  ;;  %1409 = vmatprep.subr.bf16.mxu1 %v1656_v6  ;;  %v1772_v45 = vld [vmem:[#allocation2] sm:$0xff]   ;;  %s1662_s21 = smov [#allocation7]  }
  0x23   :  { %1407 = vmatmul.mubr.msk.f32.vlgmr.msra.gmra.mxu0 %vm73_vm0, %v63_v3  ;;  %1415 = vmatprep.subr.mxu0 %v1656_v6  ;;  %s1331_s0 = sshll.u32 %s1662_s21, 4  ;;  %s1332_s0 = int_to_ptr.vmem [resolvable:$true] %s1331_s0 }
  0x24   :  { %1411 = vmatprep.mubr.msk.bf16.mxu1 %vm1657_vm1, %v1656_v6  ;;  %1419 = vmatprep.mubr.msk.f32.mxu0 %vm1657_vm1, %v1656_v6  ;;  %s1600_s4 = scalar_lea.vmem %s1332_s0, 256  ;;  %p1605_p11 = scmp.lt.s32.totalorder %s1332_s0, %s1332_s0 }
  0x25   :  { %p1601_p10 = scmp.ne.s32.totalorder %s1332_s0, %s1600_s4  ;;  %p1606_p12 = scmp.lt.s32.totalorder %s1600_s4, %s1600_s4 }
  0x27   :  { %p1607_p13 = por %p1606_p12, %p1605_p11 }
  0x29   :  { %p1608_p0 = pnand %p1607_p13, %p1601_p10 }
  0xe3   :  { %v1408_v8 = vpop.f32.mrf.mxu0 }
  0xe4   :  { %v1735_v9 = vadd.f32 %v1408_v8, %v1362_v7 }
  0xe5   :  { %v146_v10 = vpop.f32.mrf.mxu0 }
  0xe6   :  { %v1737_v11 = vadd.f32 %v1362_v7, %v146_v10  ;;  %v174_v12 = vsub.f32 0.0, %v1735_v9  ;;  %v156_v13 = vand.u32 2147483647, %v1735_v9  ;;  %v170_v35 = vmax.f32 %v1735_v9, 0.0 }
  0xe8   :  { %v185_v14 = vpack.c.bf16 %v1735_v9, %v1737_v11  ;;  %v177_v15 = vmul.f32 1.442695, %v174_v12  ;;  %v158_v16 = vsub.f32 0.0, %v156_v13  ;;  %v155_v17 = vand.u32 2147483647, %v1737_v11 }
  0xe9   :  { %v173_v21 = vsub.f32 0.0, %v1737_v11  ;;  %v169_v40 = vmax.f32 %v1737_v11, 0.0 }
  0xea   :  { %192 = vrot.lane.b32.xlu0 %v185_v14, %s1658_s22  ;;  %1528 = vpow2.f32 %v177_v15  ;;  %v161_v18 = vmul.f32 1.442695, %v158_v16  ;;  %v157_v19 = vsub.f32 0.0, %v155_v17 }
  0xeb   :  { %v175_v22 = vmul.f32 1.442695, %v173_v21 }
  0xec   :  { %1530 = vpow2.f32 %v161_v18  ;;  %v159_v20 = vmul.f32 1.442695, %v157_v19 }
  0xee   :  { %1532 = vpow2.f32 %v159_v20 }
  0xef   :  { %1534 = vpow2.f32 %v175_v22 }
  0xf7   :  { %v1529_v23 = vpop.eup %1528 }
  0xf8   :  { %v180_v24 = vadd.f32 1.0, %v1529_v23 }
  0xf9   :  { %v1531_v25 = vpop.eup %1530 }
  0xfa   :  { %1536 = vrcp.f32 %v180_v24  ;;  %v164_v26 = vadd.f32 1.0, %v1531_v25 }
  0xfb   :  { %v1533_v27 = vpop.eup %1532 }
  0xfc   :  { %1538 = vlog2.f32 %v164_v26  ;;  %v163_v28 = vadd.f32 1.0, %v1533_v27  ;;  %v1535_v29 = vpop.eup %1534 }
  0xfd   :  { %v179_v30 = vadd.f32 1.0, %v1535_v29 }
  0xfe   :  { %1540 = vlog2.f32 %v163_v28 }
  0xff   :  { %1542 = vrcp.f32 %v179_v30 }
 0x107   :  { %v1746_v31 = vpop.eup %1536 }
 0x108   :  { %296 = vperm.xlu0 %1516, %v1746_v31  }
 0x109   :  { %v1539_v32 = vpop.eup %1538 }
 0x10a   :  { %v168_v34 = vmul.f32 0.6931472, %v1539_v32 }
 0x10b   :  { %v1541_v36 = vpop.eup %1540 }
 0x10c   :  { %1519 = vset.pattern.permute.xlu0 %v1659_v37  ;;  %v1755_v38 = vadd.f32 %v170_v35, %v168_v34  ;;  %v166_v39 = vmul.f32 0.6931472, %v1541_v36  ;;  %v1763_v42 = vpop.eup %1542 }
 0x10d   :  { %258 = vperm.xlu0 %1519, %v1752_v33  }
 0x10e   :  { %246 = vperm.xlu1 %1517, %v1755_v38   ;;  %v1760_v41 = vadd.f32 %v169_v40, %v166_v39 }
 0x111   :  { %1526 = vset.pattern.permute.xlu0 %v1654_v4 }
 0x112   :  { %241 = vperm.xlu1 %1517, %v1760_v41  }
 0x116   :  { %1518 = vset.pattern.permute.xlu1 %v1654_v4 }
 0x117   :  { %291 = vperm.xlu1 %1518, %v1763_v42  }
 0x11b   :  { %1520 = vset.pattern.permute.xlu1 %v1659_v37 }
 0x11c   :  { %253 = vperm.xlu1 %1520, %v1769_v43  }
 0x15c   :  { %v193_v44 = vpop.permute.xlu0 %192 }
 0x15d   :  { %1410 = vmatpush3.bf16.msra.mxu1 %v193_v44 }
 0x15e   :  { %1428 = vmatprep.subr.mxu1 %v1656_v6 }
 0x160   :  { %1412 = vmatmul.mubr.msk.bf16.vlgmr.msra.gmra.mxu1 %vm73_vm0, %v1772_v45 }
 0x161   :  { %1432 = vmatprep.mubr.msk.f32.mxu1 %vm1657_vm1, %v1656_v6 }
 0x183   :  { %v1801_v63 = vpop.permute.xlu0 %296 }
 0x184   :  { %v300_v1 = vmul.f32 %v1801_v63, %v1735_v9 }
 0x188   :  { %v1811_v3 = vpop.permute.xlu0 %258 }
 0x189   :  { %v1779_v46 = vpop.permute.xlu1 %246  ;;  %v262_v10 = vmul.f32 %v1811_v3, %v1735_v9 }
 0x18a   :  { %v250_v47 = vmul.f32 %v1779_v46, %v1735_v9 }
 0x18c   :  { %v336_v48 = vsub.f32 %v250_v47, %v1735_v9  ;;  %v324_v0 = vmul.f32 0.25, %v250_v47 }
 0x18d   :  { %v1784_v49 = vpop.permute.xlu1 %241 }
 0x18e   :  { %v249_v50 = vmul.f32 %v1784_v49, %v1737_v11  ;;  %v338_v52 = vmul.f32 %v336_v48, %v336_v48  ;;  %v1849_v48 = vld [vmem:[%s2134_s3] sm:$0xf] }
 0x190   :  { %v335_v51 = vsub.f32 %v249_v50, %v1737_v11  ;;  %v341_v55 = vsel %vm339_vm2, %v338_v52, 0.0  ;;  %v323_v2 = vmul.f32 0.25, %v249_v50 }
 0x192   :  { %v337_v53 = vmul.f32 %v335_v51, %v335_v51  ;;  %v1794_v59 = vpop.permute.xlu1 %291 }
 0x193   :  { %v299_v62 = vmul.f32 %v1794_v59, %v1737_v11 }
 0x194   :  { %v340_v54 = vsel %vm339_vm2, %v337_v53, 0.0 }
 0x195   :  { %v1791_v56 = vadd.f32 %v341_v55, %v340_v54 }
 0x197   :  { %v1813_v4 = vpop.permute.xlu1 %253 }
 0x198   :  { %v261_v5 = vmul.f32 %v1813_v4, %v1737_v11 }
 0x220   :  { %v232_v57 = vpop.f32.mrf.mxu1 }
 0x221   :  { %265 = vrot.lane.b32.xlu0 %v232_v57, %s1653_s16 }
 0x222   :  { %v1413_v58 = vpop.f32.mrf.mxu1 }
 0x224   :  { %v235_v60 = vpop.f32.mrf.mxu1 }
 0x225   :  { %277 = vrot.lane.b32.xlu0 %v1737_v11, %s1658_s22  ;;  %267 = vrot.lane.b32.xlu1 %v235_v60, %s1653_s16 }
 0x226   :  { %v1414_v61 = vpop.f32.mrf.mxu1 }
 0x229   :  { %303 = vrot.lane.b32.xlu0 %v299_v62, %s1653_s16  ;;  %279 = vrot.lane.b32.xlu1 %v1735_v9, %s1658_s22 }
 0x22d   :  { %329 = vrot.lane.b32.xlu0 %v324_v0, %s1653_s16  ;;  %305 = vrot.lane.b32.xlu1 %v300_v1, %s1653_s16 }
 0x231   :  { %327 = vrot.lane.b32.xlu1 %v323_v2, %s1653_s16 }
 0x293   :  { %v266_v7 = vpop.permute.xlu0 %265 }
 0x294   :  { %v271_v8 = vsub.f32 %v261_v5, %v266_v7 }
 0x296   :  { %v273_v14 = vmul.f32 0.5, %v271_v8 }
 0x297   :  { %v1819_v12 = vpop.permute.xlu0 %277  ;;  %v268_v13 = vpop.permute.xlu1 %267 }
 0x298   :  { %v272_v15 = vsub.f32 %v262_v10, %v268_v13  ;;  %v283_v16 = vsub.f32 %v1737_v11, %v1819_v12 }
 0x29a   :  { %v285_v17 = vadd.f32 %v283_v16, %v273_v14  ;;  %v274_v19 = vmul.f32 0.5, %v272_v15 }
 0x29b   :  { %v1823_v18 = vpop.permute.xlu1 %279  ;;  %v304_v22 = vpop.permute.xlu0 %303 }
 0x29c   :  { %v287_v20 = vsub.f32 0.0, %v285_v17  ;;  %v284_v21 = vsub.f32 %v1735_v9, %v1823_v18 }
 0x29e   :  { %v309_v23 = vsub.f32 %v287_v20, %v304_v22  ;;  %v286_v24 = vadd.f32 %v284_v21, %v274_v19 }
 0x29f   :  { %v306_v25 = vpop.permute.xlu1 %305  ;;  %v330_v29 = vpop.permute.xlu0 %329 }
 0x2a0   :  { %v311_v26 = vmul.f32 0.25, %v309_v23  ;;  %v288_v27 = vsub.f32 0.0, %v286_v24  ;;  %v1832_v35 = vadd.f32 %v330_v29, %v1735_v9 }
 0x2a2   :  { %v310_v28 = vsub.f32 %v288_v27, %v306_v25  ;;  %315 = vrot.lane.b32.xlu0 %v311_v26, %s1658_s22  ;;  %v508_v17 = vmul.f32 %v1832_v35, %v1811_v3  ;;  %v522_v24 = vsub.f32 %v1832_v35, %v1823_v18 }
 0x2a3   :  { %v328_v30 = vpop.permute.xlu1 %327 }
 0x2a4   :  { %v312_v32 = vmul.f32 0.25, %v310_v28  ;;  %v1829_v34 = vadd.f32 %v328_v30, %v1737_v11 }
 0x2a6   :  { %317 = vrot.lane.b32.xlu1 %v312_v32, %s1658_s22  ;;  %v459_v36 = vpack.c.bf16 %v1832_v35, %v1829_v34  ;;  %v507_v10 = vmul.f32 %v1829_v34, %v1813_v4  ;;  %v521_v16 = vsub.f32 %v1829_v34, %v1819_v12 }
 0x2aa   :  { %461 = vrot.lane.b32.xlu1 %v459_v36, %s1658_s22 }
 0x314   :  { %v316_v37 = vpop.permute.xlu0 %315 }
 0x315   :  { %v1839_v39 = vadd.f32 %v316_v37, %v1737_v11 }
 0x317   :  { %v505_v40 = vmul.f32 %v1839_v39, %v1784_v49  ;;  %v527_v0 = vmul.f32 %v1839_v39, %v1794_v59 }
 0x318   :  { %v318_v44 = vpop.permute.xlu1 %317 }
 0x319   :  { %v1844_v47 = vadd.f32 %v318_v44, %v1735_v9  ;;  %1416 = vmatpush3.msra.mxu0 %v318_v44  ;;  %v563_v50 = vsub.f32 %v505_v40, %v1839_v39  ;;  %v551_v8 = vmul.f32 0.25, %v505_v40 }
 0x31a   :  { %1417 = vmatprep.subr.mxu0 %v1656_v6 }
 0x31b   :  { %1418 = vmatpush3.msra.mxu0 %v316_v37  ;;  %v506_v11 = vmul.f32 %v1844_v47, %v1779_v46  ;;  %v565_v52 = vmul.f32 %v563_v50, %v563_v50  ;;  %v528_v7 = vmul.f32 %v1844_v47, %v1801_v63 }
 0x31c   :  { %1420 = vmatmul.mubr.msk.f32.vlgmr.msra.gmra.mxu0 %vm73_vm0, %v1849_v48  ;;  %1422 = vmatprep.subr.bf16.mxu0 %v1656_v6  ;;  %v462_v9 = vpop.permute.xlu1 %461 }
 0x31d   :  { %1423 = vmatpush3.bf16.msra.mxu0 %v462_v9  ;;  %1424 = vmatprep.mubr.msk.bf16.mxu0 %vm1657_vm1, %v1656_v6  ;;  %v564_v51 = vsub.f32 %v506_v11, %v1844_v47  ;;  %v567_v54 = vsel %vm339_vm2, %v565_v52, 0.0  ;;  %v552_v5 = vmul.f32 0.25, %v506_v11 }
 0x31e   :  { %1441 = vmatprep.subr.mxu0 %v1656_v6 }
 0x31f   :  { %v566_v53 = vmul.f32 %v564_v51, %v564_v51 }
 0x320   :  { %1425 = vmatmul.mubr.msk.bf16.vlgmr.msra.gmra.mxu0 %vm73_vm0, %v1772_v45 }
 0x321   :  { %v568_v55 = vsel %vm339_vm2, %v566_v53, 0.0  ;;  %1445 = vmatprep.mubr.msk.f32.mxu0 %vm1657_vm1, %v1656_v6 }
 0x322   :  { %v1868_v57 = vadd.f32 %v568_v55, %v567_v54 }
 0x3dc   :  { %v1870_v58 = vpop.f32.mrf.mxu0 }
 0x3de   :  { %v1421_v60 = vpop.f32.mrf.mxu0 }
 0x3e0   :  { %v498_v61 = vpop.f32.mrf.mxu0 }
 0x3e1   :  { %511 = vrot.lane.b32.xlu1 %v498_v61, %s1653_s16 }
 0x3e2   :  { %v1426_v62 = vpop.f32.mrf.mxu0 }
 0x3e4   :  { %v501_v1 = vpop.f32.mrf.mxu0 }
 0x3e5   :  { %531 = vrot.lane.b32.xlu1 %v527_v0, %s1653_s16  ;;  %513 = vrot.lane.b32.xlu0 %v501_v1, %s1653_s16 }
 0x3e6   :  { %v1427_v2 = vpop.f32.mrf.mxu0 }
 0x3e9   :  { %557 = vrot.lane.b32.xlu1 %v552_v5, %s1653_s16  ;;  %533 = vrot.lane.b32.xlu0 %v528_v7, %s1653_s16 }
 0x3ed   :  { %555 = vrot.lane.b32.xlu0 %v551_v8, %s1653_s16 }
 0x453   :  { %v512_v13 = vpop.permute.xlu1 %511 }
 0x454   :  { %v517_v14 = vsub.f32 %v507_v10, %v512_v13 }
 0x456   :  { %v519_v15 = vmul.f32 0.5, %v517_v14 }
 0x457   :  { %v514_v19 = vpop.permute.xlu0 %513  ;;  %v532_v25 = vpop.permute.xlu1 %531 }
 0x458   :  { %v523_v20 = vadd.f32 %v521_v16, %v519_v15  ;;  %v518_v21 = vsub.f32 %v508_v17, %v514_v19 }
 0x45a   :  { %v525_v22 = vsub.f32 0.0, %v523_v20  ;;  %v520_v23 = vmul.f32 0.5, %v518_v21 }
 0x45b   :  { %v534_v26 = vpop.permute.xlu0 %533  ;;  %v558_v37 = vpop.permute.xlu1 %557 }
 0x45c   :  { %v537_v27 = vsub.f32 %v525_v22, %v532_v25  ;;  %v524_v28 = vadd.f32 %v522_v24, %v520_v23  ;;  %v1895_v50 = vadd.f32 %v558_v37, %v1832_v35 }
 0x45e   :  { %v539_v29 = vmul.f32 0.25, %v537_v27  ;;  %v526_v30 = vsub.f32 0.0, %v524_v28 }
 0x45f   :  { %v556_v32 = vpop.permute.xlu0 %555 }
 0x460   :  { %v538_v36 = vsub.f32 %v526_v30, %v534_v26  ;;  %543 = vrot.lane.b32.xlu1 %v539_v29, %s1658_s22  ;;  %v1892_v44 = vadd.f32 %v556_v32, %v1829_v34 }
 0x462   :  { %v540_v40 = vmul.f32 0.25, %v538_v36  ;;  %v682_v11 = vpack.c.bf16 %v1895_v50, %v1892_v44  ;;  %v730_v27 = vmul.f32 %v1892_v44, %v1813_v4  ;;  %v744_v32 = vsub.f32 %v1892_v44, %v1819_v12 }
 0x464   :  { %545 = vrot.lane.b32.xlu0 %v540_v40, %s1658_s22 }
 0x468   :  { %684 = vrot.lane.b32.xlu0 %v682_v11, %s1658_s22 }
 0x4d2   :  { %v544_v9 = vpop.permute.xlu1 %543 }
 0x4d3   :  { %v1902_v51 = vadd.f32 %v544_v9, %v1839_v39 }
 0x4d5   :  { %v728_v52 = vmul.f32 %v1902_v51, %v1784_v49  ;;  %v750_v19 = vmul.f32 %v1902_v51, %v1794_v59 }
 0x4d6   :  { %v546_v53 = vpop.permute.xlu0 %545 }
 0x4d7   :  { %v1907_v34 = vadd.f32 %v546_v53, %v1844_v47  ;;  %1429 = vmatpush3.msra.mxu1 %v546_v53  ;;  %v774_v35 = vmul.f32 0.25, %v728_v52  ;;  %v786_v54 = vsub.f32 %v728_v52, %v1902_v51 }
 0x4d8   :  { %1430 = vmatprep.subr.mxu1 %v1656_v6 }
 0x4d9   :  { %778 = vrot.lane.b32.xlu1 %v774_v35, %s1653_s16  ;;  %1431 = vmatpush3.msra.mxu1 %v544_v9  ;;  %v729_v39 = vmul.f32 %v1907_v34, %v1779_v46  ;;  %v788_v61 = vmul.f32 %v786_v54, %v786_v54  ;;  %v751_v23 = vmul.f32 %v1907_v34, %v1801_v63 }
 0x4da   :  { %1433 = vmatmul.mubr.msk.f32.vlgmr.msra.gmra.mxu1 %vm73_vm0, %v1849_v48  ;;  %1435 = vmatprep.subr.bf16.mxu1 %v1656_v6  ;;  %v685_v55 = vpop.permute.xlu0 %684  ;;  %v731_v9 = vmul.f32 %v1895_v50, %v1811_v3 }
 0x4db   :  { %1436 = vmatpush3.bf16.msra.mxu1 %v685_v55  ;;  %1437 = vmatprep.mubr.msk.bf16.mxu1 %vm1657_vm1, %v1656_v6  ;;  %v775_v47 = vmul.f32 0.25, %v729_v39  ;;  %v787_v60 = vsub.f32 %v729_v39, %v1907_v34  ;;  %v790_v0 = vsel %vm339_vm2, %v788_v61, 0.0 }
 0x4dc   :  { %1454 = vmatprep.subr.mxu1 %v1656_v6 }
 0x4dd   :  { %780 = vrot.lane.b32.xlu0 %v775_v47, %s1653_s16  ;;  %v789_v62 = vmul.f32 %v787_v60, %v787_v60 }
 0x4de   :  { %1438 = vmatmul.mubr.msk.bf16.vlgmr.msra.gmra.mxu1 %vm73_vm0, %v1772_v45 }
 0x4df   :  { %v791_v1 = vsel %vm339_vm2, %v789_v62, 0.0  ;;  %1458 = vmatprep.mubr.msk.f32.mxu1 %vm1657_vm1, %v1656_v6 }
 0x4e0   :  { %v1928_v2 = vadd.f32 %v791_v1, %v790_v0  ;;  %v436_v1 = vmul.f32 %v1870_v58, %v1870_v58 }
 0x54b   :  { %v779_v5 = vpop.permute.xlu1 %778 }
 0x54c   :  { %v1931_v7 = vadd.f32 %v779_v5, %v1892_v44  ;;  %v745_v44 = vsub.f32 %v1895_v50, %v1823_v18  ;;  %v438_v5 = vsel %vm437_vm3, %v436_v1, 0.0 }
 0x54e   :  { %v905_v8 = vmul.f32 %v1931_v7, %v1931_v7 }
 0x54f   :  { %v781_v14 = vpop.permute.xlu0 %780 }
 0x550   :  { %909 = vrot.lane.b32.xlu0 %v905_v8, %s1658_s22  ;;  %v1940_v17 = vadd.f32 %v781_v14, %v1895_v50 }
 0x552   :  { %v906_v22 = vmul.f32 %v1940_v17, %v1940_v17  ;;  %v1521_v26 = vpack.i.bf16 %v1940_v17, %v1931_v7 }
 0x59a   :  { %v1936_v10 = vpop.f32.mrf.mxu1 }
 0x59c   :  { %v1434_v13 = vpop.f32.mrf.mxu1 }
 0x59e   :  { %v721_v15 = vpop.f32.mrf.mxu1 }
 0x59f   :  { %734 = vrot.lane.b32.xlu0 %v721_v15, %s1653_s16 }
 0x5a0   :  { %v1439_v16 = vpop.f32.mrf.mxu1 }
 0x5a2   :  { %v724_v20 = vpop.f32.mrf.mxu1 }
 0x5a3   :  { %754 = vrot.lane.b32.xlu0 %v750_v19, %s1653_s16  ;;  %736 = vrot.lane.b32.xlu1 %v724_v20, %s1653_s16 }
 0x5a4   :  { %v1440_v21 = vpop.f32.mrf.mxu1 }
 0x5a7   :  { %911 = vrot.lane.b32.xlu1 %v906_v22, %s1658_s22 }
 0x5ab   :  { %756 = vrot.lane.b32.xlu1 %v751_v23, %s1653_s16 }
 0x5c2   :  { %v910_v24 = vpop.permute.xlu0 %909 }
 0x5c3   :  { %v915_v25 = vsel %vm339_vm2, %v910_v24, 0.0 }
 0x5cf   :  { %916 = vadd.xlane.f32.xlu1 %v915_v25 }
 0x5e0   :  { %1522 = vrot.lane.b32.xlu1 %v1521_v26, %s1658_s22 }
 0x611   :  { %v735_v28 = vpop.permute.xlu0 %734 }
 0x612   :  { %v740_v29 = vsub.f32 %v730_v27, %v735_v28 }
 0x614   :  { %v742_v30 = vmul.f32 0.5, %v740_v29 }
 0x615   :  { %v737_v36 = vpop.permute.xlu1 %736  ;;  %v755_v11 = vpop.permute.xlu0 %754 }
 0x616   :  { %v746_v37 = vadd.f32 %v744_v32, %v742_v30  ;;  %v741_v54 = vsub.f32 %v731_v9, %v737_v36 }
 0x618   :  { %v748_v40 = vsub.f32 0.0, %v746_v37  ;;  %v743_v55 = vmul.f32 0.5, %v741_v54 }
 0x619   :  { %v912_v52 = vpop.permute.xlu1 %911 }
 0x61a   :  { %v760_v53 = vsub.f32 %v748_v40, %v755_v11  ;;  %v918_v35 = vsel %vm339_vm2, %v912_v52, 0.0  ;;  %v747_v47 = vadd.f32 %v745_v44, %v743_v55 }
 0x61b   :  { %919 = vadd.xlane.f32.xlu0 %v918_v35 }
 0x61c   :  { %v762_v39 = vmul.f32 0.25, %v760_v53  ;;  %v749_v60 = vsub.f32 0.0, %v747_v47 }
 0x61d   :  { %v757_v61 = vpop.permute.xlu1 %756 }
 0x61e   :  { %766 = vrot.lane.b32.xlu1 %v762_v39, %s1658_s22  ;;  %v761_v62 = vsub.f32 %v749_v60, %v757_v61 }
 0x620   :  { %v763_v0 = vmul.f32 0.25, %v761_v62 }
 0x631   :  { %768 = vrot.lane.b32.xlu0 %v763_v0, %s1658_s22 }
 0x642   :  { %439 = vadd.xlane.f32.xlu1 %v438_v5 }
 0x650   :  { %343 = vadd.xlane.f32.xlu0 %v1791_v56 }
 0x654   :  { %570 = vadd.xlane.f32.xlu0 %v1868_v57 }
 0x658   :  { %v1972_v8 = vpop.xlane.xlu1 %916 }
 0x65c   :  { %v1523_v50 = vpop.permute.xlu1 %1522 }
 0x65d   :  { %v1525_v14 = vunpack.i.h.bf16 %v1523_v50  ;;  %v1524_v15 = vunpack.i.l.bf16 %v1523_v50 }
 0x65f   :  { %v929_v20 = vsel %vm339_vm2, %v1524_v15, %v1972_v8 }
 0x690   :  { %v1978_v58 = vpop.permute.xlu1 %766 }
 0x6a4   :  { %v1974_v13 = vpop.xlane.xlu0 %919 }
 0x6a5   :  { %v930_v16 = vsel %vm339_vm2, %v1525_v14, %v1974_v13 }
 0x6a6   :  { %v931_v56 = vpack.c.bf16 %v930_v16, %v929_v20 }
 0x6a8   :  { %v769_v19 = vpop.permute.xlu0 %768 }
 0x6a9   :  { %1442 = vmatpush3.msra.mxu0 %v769_v19  ;;  %v1996_v50 = vadd.f32 %v769_v19, %v1907_v34 }
 0x6aa   :  { %1443 = vmatprep.subr.mxu0 %v1656_v6 }
 0x6ab   :  { %1444 = vmatpush3.msra.mxu0 %v1978_v58  ;;  %v996_v34 = vmul.f32 %v1996_v50, %v1801_v63 }
 0x6ac   :  { %1446 = vmatmul.mubr.msk.f32.vlgmr.msra.gmra.mxu0 %vm73_vm0, %v1849_v48  ;;  %1448 = vmatprep.subr.bf16.mxu0 %v1656_v6 }
 0x6ad   :  { %1449 = vmatpush3.bf16.msra.mxu0 %v931_v56  ;;  %1450 = vmatprep.mubr.msk.bf16.mxu0 %vm1657_vm1, %v1656_v6 }
 0x6b0   :  { %1451 = vmatmul.mubr.msk.bf16.vlgmr.msra.gmra.mxu0 %vm73_vm0, %v1772_v45 }
 0x6cb   :  { %v440_v27 = vpop.xlane.xlu1 %439 }
 0x6cc   :  { %v441_v28 = vrot.slane %v440_v27, 4 }
 0x6ce   :  { %v442_v30 = vadd.f32 %v441_v28, %v440_v27  ;;  %v975_v28 = vmul.f32 %v1931_v7, %v1813_v4 }
 0x6d0   :  { %v443_v32 = vrot.slane %v442_v30, 2 }
 0x6d2   :  { %v444_v36 = vadd.f32 %v443_v32, %v442_v30  ;;  %v976_v32 = vmul.f32 %v1940_v17, %v1811_v3 }
 0x6d4   :  { %v445_v40 = vrot.slane %v444_v36, 1 }
 0x6d6   :  { %v446_v53 = vadd.f32 %v445_v40, %v444_v36  ;;  %v989_v40 = vsub.f32 %v1931_v7, %v1819_v12 }
 0x6d9   :  { %v344_v57 = vpop.xlane.xlu0 %343 }
 0x6da   :  { %v345_v21 = vrot.slane %v344_v57, 4 }
 0x6dc   :  { %v346_v22 = vadd.f32 %v345_v21, %v344_v57  ;;  %v2004_v57 = vadd.f32 %v1978_v58, %v1902_v51  ;;  %v990_v58 = vsub.f32 %v1940_v17, %v1823_v18 }
 0x6dd   :  { %v571_v35 = vpop.xlane.xlu0 %570 }
 0x6de   :  { %v347_v23 = vrot.slane %v346_v22, 2  ;;  %v572_v54 = vrot.slane %v571_v35, 4 }
 0x6e0   :  { %v348_v24 = vadd.f32 %v347_v23, %v346_v22  ;;  %v573_v55 = vadd.f32 %v572_v54, %v571_v35  ;;  %v995_v22 = vmul.f32 %v2004_v57, %v1794_v59  ;;  %v660_v23 = vmul.f32 %v1936_v10, %v1936_v10 }
 0x6e2   :  { %v349_v25 = vrot.slane %v348_v24, 1  ;;  %v574_v44 = vrot.slane %v573_v55, 2  ;;  %v661_v51 = vsel %vm437_vm3, %v660_v23, 0.0 }
 0x6e4   :  { %v350_v26 = vadd.f32 %v349_v25, %v348_v24  ;;  %v575_v47 = vadd.f32 %v574_v44, %v573_v55  ;;  %v1195_v24 = vmul.f32 %v990_v58, %v990_v58 }
 0x6e6   :  { %1468 = vpush %v350_v26  ;;  %v576_v62 = vrot.slane %v575_v47, 1 }
 0x6e8   :  { %v577_v16 = vadd.f32 %v576_v62, %v575_v47 }
 0x717   :  { %s1469_s3 = spop %1468 }
 0x718   :  { %v352_v29 = vstv %s1469_s3 }
 0x719   :  { %1544 = vrsqrt.f32 %v352_v29  ;;  %vm355_vm4 = vcmp.eq.f32.partialorder %v352_v29, inf  ;;  %v358_v45 = vand.u32 2147483648, %v352_v29  ;;  %vm357_vm5 = vcmp.eq.f32.partialorder %v352_v29, 0.0 }
 0x726   :  { %v1545_v37 = vpop.eup %1544 }
 0x727   :  { %v354_v11 = vmul.f32 %v1545_v37, %v352_v29 }
 0x729   :  { %v356_v9 = vsel %vm355_vm4, %v352_v29, %v354_v11 }
 0x72a   :  { %v359_v52 = vsel %vm357_vm5, %v358_v45, %v356_v9 }
 0x72b   :  { %1470 = vpush %v359_v52 }
 0x72c   :  { %1472 = vpush %v446_v53 }
 0x75c   :  { %s1991_s27 = spop %1470 }
 0x75d   :  { %s1473_s28 = spop %1472 }
 0x75e   :  { %v448_v39 = vstv %s1473_s28 }
 0x75f   :  { %1546 = vrsqrt.f32 %v448_v39  ;;  %vm451_vm6 = vcmp.eq.f32.partialorder %v448_v39, inf  ;;  %v454_v5 = vand.u32 2147483648, %v448_v39  ;;  %vm453_vm7 = vcmp.eq.f32.partialorder %v448_v39, 0.0 }
 0x76c   :  { %v1547_v60 = vpop.eup %1546  ;;  %v1993_v61 = vpop.f32.mrf.mxu0 }
 0x76d   :  { %v450_v0 = vmul.f32 %v1547_v60, %v448_v39 }
 0x76e   :  { %v1447_v1 = vpop.f32.mrf.mxu0 }
 0x76f   :  { %v452_v14 = vsel %vm451_vm6, %v448_v39, %v450_v0 }
 0x770   :  { %v455_v15 = vsel %vm453_vm7, %v454_v5, %v452_v14  ;;  %v1998_v20 = vpop.f32.mrf.mxu0 }
 0x771   :  { %1474 = vpush %v455_v15  ;;  %979 = vrot.lane.b32.xlu1 %v1998_v20, %s1653_s16  ;;  %v1194_v15 = vmul.f32 %v989_v40, %v989_v40 }
 0x772   :  { %1476 = vpush %v577_v16  ;;  %v1452_v56 = vpop.f32.mrf.mxu0  ;;  %v1151_v16 = vmul.f32 %v1996_v50, %v1996_v50 }
 0x774   :  { %v969_v19 = vpop.f32.mrf.mxu0  ;;  %v1155_v56 = vsel %vm339_vm2, %v1151_v16, 0.0 }
 0x775   :  { %1001 = vrot.lane.b32.xlu1 %v996_v34, %s1653_s16  ;;  %981 = vrot.lane.b32.xlu0 %v969_v19, %s1653_s16  ;;  %v1150_v34 = vmul.f32 %v2004_v57, %v2004_v57 }
 0x776   :  { %v1453_v21 = vpop.f32.mrf.mxu0 }
 0x779   :  { %999 = vrot.lane.b32.xlu0 %v995_v22, %s1653_s16 }
 0x799   :  { %662 = vadd.xlane.f32.xlu1 %v661_v51 }
 0x7a2   :  { %s2016_s29 = spop %1474 }
 0x7a3   :  { %s1477_s30 = spop %1476 }
 0x7a4   :  { %v579_v63 = vstv %s1477_s30 }
 0x7a5   :  { %1548 = vrsqrt.f32 %v579_v63  ;;  %vm582_vm8 = vcmp.eq.f32.partialorder %v579_v63, inf  ;;  %v585_v10 = vand.u32 2147483648, %v579_v63  ;;  %vm584_vm9 = vcmp.eq.f32.partialorder %v579_v63, 0.0 }
 0x7aa   :  { %1200 = vrot.lane.b32.xlu1 %v1195_v24, %s1658_s22 }
 0x7ae   :  { %1182 = vrot.lane.b32.xlu1 %v969_v19, %s1658_s22 }
 0x7b2   :  { %v1549_v59 = vpop.eup %1548 }
 0x7b3   :  { %v581_v25 = vmul.f32 %v1549_v59, %v579_v63 }
 0x7b5   :  { %v583_v26 = vsel %vm582_vm8, %v579_v63, %v581_v25 }
 0x7b6   :  { %v586_v27 = vsel %vm584_vm9, %v585_v10, %v583_v26 }
 0x7b7   :  { %1478 = vpush %v586_v27  ;;  %v457_v27 = vstv %s2016_s29 }
 0x7e3   :  { %v980_v29 = vpop.permute.xlu1 %979 }
 0x7e4   :  { %v985_v30 = vsub.f32 %v975_v28, %v980_v29  ;;  %v1162_v12 = vmul.f32 %v980_v29, %v1931_v7 }
 0x7e6   :  { %v987_v18 = vmul.f32 0.5, %v985_v30  ;;  %v883_v30 = vmul.f32 %v1993_v61, %v1993_v61  ;;  %v1159_v61 = vmul.f32 0.5, %v1755_v38 }
 0x7e7   :  { %v982_v36 = vpop.permute.xlu0 %981  ;;  %v1002_v35 = vpop.permute.xlu1 %1001 }
 0x7e8   :  { %v986_v37 = vsub.f32 %v976_v32, %v982_v36  ;;  %v991_v45 = vadd.f32 %v989_v40, %v987_v18  ;;  %v1163_v3 = vmul.f32 %v982_v36, %v1940_v17  ;;  %s2042_s9 = spop %1478  ;;  %v884_v40 = vsel %vm437_vm3, %v883_v30, 0.0 }
 0x7ea   :  { %v988_v11 = vmul.f32 0.5, %v986_v37  ;;  %v993_v53 = vsub.f32 0.0, %v991_v45 }
 0x7eb   :  { %v1000_v54 = vpop.permute.xlu0 %999 }
 0x7ec   :  { %v992_v9 = vadd.f32 %v990_v58, %v988_v11  ;;  %v1005_v4 = vsub.f32 %v993_v53, %v1000_v54 }
 0x7ee   :  { %v994_v52 = vsub.f32 0.0, %v992_v9  ;;  %v1007_v44 = vmul.f32 0.25, %v1005_v4 }
 0x7f0   :  { %v1006_v39 = vsub.f32 %v994_v52, %v1002_v35 }
 0x7f2   :  { %v1008_v55 = vmul.f32 0.25, %v1006_v39 }
 0x7f4   :  { %1013 = vrot.lane.b32.xlu0 %v1008_v55, %s1658_s22 }
 0x7f8   :  { %1011 = vrot.lane.b32.xlu0 %v1007_v44, %s1658_s22 }
 0x7fc   :  { %1168 = vrot.lane.b32.xlu0 %v1163_v3, %s1658_s22 }
 0x800   :  { %1166 = vrot.lane.b32.xlu0 %v1162_v12, %s1658_s22 }
 0x81f   :  { %793 = vadd.xlane.f32.xlu0 %v1928_v2  ;;  %v1152_v2 = vsel %vm339_vm2, %v1150_v34, 0.0 }
 0x822   :  { %v663_v47 = vpop.xlane.xlu1 %662 }
 0x823   :  { %v664_v60 = vrot.slane %v663_v47, 4 }
 0x825   :  { %v665_v62 = vadd.f32 %v664_v60, %v663_v47 }
 0x826   :  { %v1201_v11 = vpop.permute.xlu1 %1200 }
 0x827   :  { %v666_v0 = vrot.slane %v665_v62, 2  ;;  %v1207_v52 = vsel %vm339_vm2, %v1201_v11, 0.0 }
 0x829   :  { %v667_v1 = vadd.f32 %v666_v0, %v665_v62  ;;  %v1179_v0 = vmul.f32 %v1974_v13, %v1752_v33  ;;  %v974_v33 = vmul.f32 %v1996_v50, %v1779_v46 }
 0x82a   :  { %v1183_v47 = vpop.permute.xlu1 %1182 }
 0x82b   :  { %v668_v5 = vrot.slane %v667_v1, 1 }
 0x82d   :  { %v669_v14 = vadd.f32 %v668_v5, %v667_v1  ;;  %v1187_v1 = vadd.f32 %v1183_v47, %v1179_v0 }
 0x82f   :  { %1480 = vpush %v669_v14  ;;  %v1178_v14 = vmul.f32 %v1972_v8, %v1769_v43  ;;  %v973_v43 = vmul.f32 %v2004_v57, %v1784_v49  ;;  %v1032_v8 = vsub.f32 %v974_v33, %v1996_v50 }
 0x831   :  { %v1031_v13 = vsub.f32 %v973_v43, %v2004_v57 }
 0x835   :  { %1198 = vrot.lane.b32.xlu0 %v1194_v15, %s1658_s22 }
 0x854   :  { %1156 = vadd.xlane.f32.xlu0 %v1155_v56 }
 0x858   :  { %1153 = vadd.xlane.f32.xlu0 %v1152_v2 }
 0x860   :  { %s1481_s10 = spop %1480 }
 0x861   :  { %v671_v19 = vstv %s1481_s10 }
 0x862   :  { %1550 = vrsqrt.f32 %v671_v19  ;;  %vm674_vm10 = vcmp.eq.f32.partialorder %v671_v19, inf  ;;  %v677_v58 = vand.u32 2147483648, %v671_v19  ;;  %vm676_vm11 = vcmp.eq.f32.partialorder %v671_v19, 0.0 }
 0x866   :  { %v2044_v21 = vpop.permute.xlu0 %1013 }
 0x867   :  { %1455 = vmatpush3.msra.mxu1 %v2044_v21 }
 0x868   :  { %1456 = vmatprep.subr.mxu1 %v1656_v6 }
 0x86a   :  { %v2048_v22 = vpop.permute.xlu0 %1011 }
 0x86b   :  { %1457 = vmatpush3.msra.mxu1 %v2048_v22 }
 0x86c   :  { %1459 = vmatmul.mubr.msk.f32.vlgmr.msra.gmra.mxu1 %vm73_vm0, %v1849_v48  ;;  %1461 = vmatprep.subr.mxu1 %v1656_v6 }
 0x86d   :  { %1465 = vmatprep.mubr.msk.f32.mxu1 %vm1657_vm1, %v1656_v6  ;;  %vm1244_vm1 = vcmask 7168  }
 0x86e   :  { %v1169_v23 = vpop.permute.xlu0 %1168 }
 0x86f   :  { %v1551_v51 = vpop.eup %1550  ;;  %v1175_v26 = vsel %vm339_vm2, %v1169_v23, 0.0 }
 0x870   :  { %v673_v63 = vmul.f32 %v1551_v51, %v671_v19  ;;  %v1225_v51 = vmul.f32 0.5, %v1746_v31 }
 0x872   :  { %v1167_v24 = vpop.permute.xlu0 %1166  ;;  %v675_v59 = vsel %vm674_vm10, %v671_v19, %v673_v63 }
 0x873   :  { %v678_v25 = vsel %vm676_vm11, %v677_v58, %v675_v59  ;;  %v1172_v10 = vsel %vm339_vm2, %v1167_v24, 0.0  ;;  %v1034_v58 = vmul.f32 %v1032_v8, %v1032_v8  ;;  %v1033_v24 = vmul.f32 %v1031_v13, %v1031_v13 }
 0x874   :  { %1482 = vpush %v678_v25  ;;  %1173 = vadd.xlane.f32.xlu1 %v1172_v10 }
 0x875   :  { %v1036_v59 = vsel %vm339_vm2, %v1034_v58, 0.0  ;;  %v1035_v31 = vsel %vm339_vm2, %v1033_v24, 0.0 }
 0x876   :  { %v1037_v25 = vadd.f32 %v1036_v59, %v1035_v31 }
 0x878   :  { %1176 = vadd.xlane.f32.xlu1 %v1175_v26 }
 0x889   :  { %1180 = vrot.lane.b32.xlu1 %v1998_v20, %s1658_s22 }
 0x8a5   :  { %s1483_s11 = spop %1482 }
 0x8a6   :  { %v680_v28 = vstv %s1483_s11 }
 0x8a7   :  { %v2061_v29 = vadd.f32 %v680_v28, %v457_v27 }
 0x8a8   :  { %v794_v18 = vpop.xlane.xlu0 %793 }
 0x8a9   :  { %v795_v32 = vrot.slane %v794_v18, 4 }
 0x8ab   :  { %v796_v36 = vadd.f32 %v795_v32, %v794_v18  ;;  %v1019_v18 = vmul.f32 0.25, %v973_v43  ;;  %v1020_v32 = vmul.f32 0.25, %v974_v33  ;;  %v1018_v33 = vadd.f32 %v2044_v21, %v1996_v50 }
 0x8ac   :  { %v1199_v37 = vpop.permute.xlu0 %1198 }
 0x8ad   :  { %v797_v45 = vrot.slane %v796_v36, 2  ;;  %885 = vadd.xlane.f32.xlu1 %v884_v40  ;;  %v1204_v9 = vsel %vm339_vm2, %v1199_v37, 0.0 }
 0x8ae   :  { %1205 = vadd.xlane.f32.xlu0 %v1204_v9 }
 0x8af   :  { %v798_v20 = vadd.f32 %v797_v45, %v796_v36 }
 0x8b1   :  { %1208 = vadd.xlane.f32.xlu1 %v1207_v52  ;;  %v799_v53 = vrot.slane %v798_v20, 1 }
 0x8b3   :  { %v800_v35 = vadd.f32 %v799_v53, %v798_v20  ;;  %v1158_v20 = vmul.f32 0.5, %v1760_v41  ;;  %v1224_v41 = vmul.f32 0.5, %v1763_v42 }
 0x8b5   :  { %1484 = vpush %v800_v35 }
 0x8dd   :  { %v1157_v54 = vpop.xlane.xlu0 %1156 }
 0x8de   :  { %v2069_v39 = vmul.f32 %v1159_v61, %v1157_v54  ;;  %v1227_v63 = vmul.f32 %v1225_v51, %v1157_v54 }
 0x8e1   :  { %v1154_v11 = vpop.xlane.xlu0 %1153 }
 0x8e2   :  { %v1160_v52 = vmul.f32 %v1158_v20, %v1154_v11 }
 0x8e6   :  { %s1485_s12 = spop %1484 }
 0x8e7   :  { %v802_v4 = vstv %s1485_s12 }
 0x8e8   :  { %1552 = vrsqrt.f32 %v802_v4  ;;  %vm805_vm12 = vcmp.eq.f32.partialorder %v802_v4, inf  ;;  %v808_v3 = vand.u32 2147483648, %v802_v4  ;;  %vm807_vm13 = vcmp.eq.f32.partialorder %v802_v4, 0.0 }
 0x8f5   :  { %v1553_v55 = vpop.eup %1552 }
 0x8f6   :  { %v804_v44 = vmul.f32 %v1553_v55, %v802_v4 }
 0x8f8   :  { %v806_v12 = vsel %vm805_vm12, %v802_v4, %v804_v44 }
 0x8f9   :  { %v809_v60 = vsel %vm807_vm13, %v808_v3, %v806_v12 }
 0x8fa   :  { %1486 = vpush %v809_v60 }
 0x8fd   :  { %v1174_v62 = vpop.xlane.xlu1 %1173 }
 0x8fe   :  { %v1188_v56 = vmul.f32 2.0, %v1174_v62 }
 0x901   :  { %v1177_v38 = vpop.xlane.xlu1 %1176 }
 0x902   :  { %v1189_v5 = vmul.f32 2.0, %v1177_v38  ;;  %v1226_v38 = vmul.f32 %v1224_v41, %v1154_v11 }
 0x904   :  { %v1191_v15 = vsub.f32 %v1187_v1, %v1189_v5 }
 0x905   :  { %v1181_v16 = vpop.permute.xlu1 %1180 }
 0x906   :  { %v1193_v34 = vmul.f32 0.125, %v1191_v15  ;;  %v1186_v2 = vadd.f32 %v1181_v16, %v1178_v14 }
 0x908   :  { %v1190_v19 = vsub.f32 %v1186_v2, %v1188_v56  ;;  %1216 = vrot.lane.b32.xlu1 %v1193_v34, %s1660_s13  ;;  %v1017_v56 = vadd.f32 %v2048_v22, %v2004_v57 }
 0x90a   :  { %v1192_v23 = vmul.f32 0.125, %v1190_v19 }
 0x90c   :  { %1214 = vrot.lane.b32.xlu0 %v1192_v23, %s1660_s13 }
 0x910   :  { %1240 = vrot.lane.b32.xlu0 %v1227_v63, %s1661_s14 }
 0x92b   :  { %s2087_s17 = spop %1486 }
 0x92c   :  { %1038 = vadd.xlane.f32.xlu1 %v1037_v25  ;;  %v1124_v10 = vpop.f32.mrf.mxu1 }
 0x92e   :  { %v1460_v26 = vpop.f32.mrf.mxu1 }
 0x92f   :  { %v588_v26 = vstv %s2042_s9 }
 0x936   :  { %v886_v27 = vpop.xlane.xlu1 %885 }
 0x937   :  { %v887_v28 = vrot.slane %v886_v27, 4  ;;  %v1206_v45 = vpop.xlane.xlu0 %1205 }
 0x938   :  { %v1210_v61 = vmul.f32 0.5, %v1206_v45 }
 0x939   :  { %v888_v46 = vadd.f32 %v887_v28, %v886_v27  ;;  %v361_v28 = vstv %s1991_s27 }
 0x93a   :  { %v1209_v9 = vpop.xlane.xlu1 %1208 }
 0x93b   :  { %v889_v30 = vrot.slane %v888_v46, 2  ;;  %v1211_v3 = vmul.f32 0.5, %v1209_v9 }
 0x93d   :  { %1023 = vrot.lane.b32.xlu1 %v1019_v18, %s1653_s16  ;;  %v890_v49 = vadd.f32 %v889_v30, %v888_v46  ;;  %v811_v46 = vstv %s2087_s17  ;;  %v589_v30 = vadd.f32 %v588_v26, %v361_v28 }
 0x93f   :  { %v891_v36 = vrot.slane %v890_v49, 1 }
 0x941   :  { %1025 = vrot.lane.b32.xlu1 %v1020_v32, %s1653_s16  ;;  %v892_v37 = vadd.f32 %v891_v36, %v890_v49  ;;  %v812_v49 = vadd.f32 %v811_v46, %v589_v30 }
 0x943   :  { %1488 = vpush %v892_v37 }
 0x974   :  { %s1489_s18 = spop %1488 }
 0x975   :  { %v894_v40 = vstv %s1489_s18 }
 0x976   :  { %1554 = vrsqrt.f32 %v894_v40  ;;  %vm897_vm14 = vcmp.eq.f32.partialorder %v894_v40, inf  ;;  %v900_v60 = vand.u32 2147483648, %v894_v40  ;;  %vm899_vm15 = vcmp.eq.f32.partialorder %v894_v40, 0.0 }
 0x97a   :  { %v1217_v53 = vpop.permute.xlu1 %1216 }
 0x97b   :  { %v1221_v4 = vadd.f32 %v1217_v53, %v2069_v39  ;;  %v1128_v39 = vmul.f32 %v1124_v10, %v1124_v10 }
 0x97d   :  { %v1223_v47 = vadd.f32 %v1221_v4, %v1211_v3  ;;  %v1129_v1 = vsel %vm437_vm3, %v1128_v39, 0.0 }
 0x97e   :  { %v1215_v35 = vpop.permute.xlu0 %1214 }
 0x97f   :  { %v1220_v54 = vadd.f32 %v1215_v35, %v1160_v52 }
 0x981   :  { %v1222_v55 = vadd.f32 %v1220_v54, %v1210_v61 }
 0x983   :  { %v1555_v44 = vpop.eup %1554  ;;  %1230 = vrot.lane.b32.xlu0 %v1222_v55, %s1661_s14 }
 0x984   :  { %v896_v12 = vmul.f32 %v1555_v44, %v894_v40 }
 0x986   :  { %v898_v62 = vsel %vm897_vm14, %v894_v40, %v896_v12 }
 0x987   :  { %1232 = vrot.lane.b32.xlu0 %v1223_v47, %s1661_s14  ;;  %v901_v0 = vsel %vm899_vm15, %v900_v60, %v898_v62 }
 0x988   :  { %1490 = vpush %v901_v0 }
 0x98b   :  { %1238 = vrot.lane.b32.xlu0 %v1226_v38, %s1661_s14 }
 0x9aa   :  { %1130 = vadd.xlane.f32.xlu0 %v1129_v1 }
 0x9b5   :  { %v1039_v5 = vpop.xlane.xlu1 %1038 }
 0x9b6   :  { %v1040_v14 = vrot.slane %v1039_v5, 4 }
 0x9b8   :  { %v1041_v15 = vadd.f32 %v1040_v14, %v1039_v5 }
 0x9b9   :  { %v1024_v16 = vpop.permute.xlu1 %1023  ;;  %s1491_s1 = spop %1490 }
 0x9ba   :  { %v1042_v42 = vrot.slane %v1041_v15, 2  ;;  %v1029_v34 = vadd.f32 %v1024_v16, %v1931_v7  ;;  %v903_v2 = vstv %s1491_s1  ;;  %v1241_v7 = vpop.permute.xlu0 %1240 }
 0x9bb   :  { %v2100_v19 = vadd.f32 %v903_v2, %v2061_v29 }
 0x9bc   :  { %v1319_v23 = vsel %vm339_vm2, %v1017_v56, %v1029_v34  ;;  %v1043_v51 = vadd.f32 %v1042_v42, %v1041_v15 }
 0x9bd   :  { %1321 = vst.msk [vmem:[#allocation7] sm:$0xff] %vm73_vm0, %v1319_v23  ;;  %v1026_v63 = vpop.permute.xlu1 %1025 }
 0x9be   :  { %v1030_v43 = vadd.f32 %v1026_v63, %v1940_v17  ;;  %v1044_v8 = vrot.slane %v1043_v51, 1 }
 0x9c0   :  { %v1320_v57 = vsel %vm339_vm2, %v1018_v33, %v1030_v43  ;;  %v1045_v22 = vadd.f32 %v1044_v8, %v1043_v51 }
 0x9c1   :  { %1322 = vst.msk [vmem:[#allocation7 + $0x8] sm:$0xff] %vm73_vm0, %v1320_v57 }
 0x9c2   :  { %1492 = vpush %v1045_v22 }
 0x9f3   :  { %s1493_s19 = spop %1492 }
 0x9f4   :  { %v1047_v29 = vstv %s1493_s19 }
 0x9f5   :  { %1556 = vrsqrt.f32 %v1047_v29  ;;  %v1231_v13 = vpop.permute.xlu0 %1230  ;;  %vm1050_vm2 = vcmp.eq.f32.partialorder %v1047_v29, inf  ;;  %v1053_v31 = vand.u32 2147483648, %v1047_v29  ;;  %vm1052_vm3 = vcmp.eq.f32.partialorder %v1047_v29, 0.0 }
 0x9f9   :  { %v1233_v58 = vpop.permute.xlu0 %1232 }
 0x9fa   :  { %v1246_v24 = vsel %vm1244_vm1, %v1233_v58, %v1241_v7 }
 0x9fb   :  { %1462 = vmatpush3.msra.mxu1 %v1246_v24 }
 0x9fc   :  { %1463 = vmatprep.subr.mxu1 %v1656_v6 }
 0x9fd   :  { %v1239_v17 = vpop.permute.xlu0 %1238 }
 0x9fe   :  { %v1245_v50 = vsel %vm1244_vm1, %v1231_v13, %v1239_v17 }
 0x9ff   :  { %1464 = vmatpush3.msra.mxu1 %v1245_v50 }
 0xa00   :  { %1466 = vmatmul.mubr.msk.f32.vlgmr.msra.gmra.mxu1 %vm73_vm0, %v1849_v48 }
 0xa02   :  { %v1557_v21 = vpop.eup %1556 }
 0xa03   :  { %v1049_v59 = vmul.f32 %v1557_v21, %v1047_v29 }
 0xa05   :  { %v1051_v25 = vsel %vm1050_vm2, %v1047_v29, %v1049_v59 }
 0xa06   :  { %v1054_v10 = vsel %vm1052_vm3, %v1053_v31, %v1051_v25 }
 0xa07   :  { %1494 = vpush %v1054_v10 }
 0xa33   :  { %v1131_v27 = vpop.xlane.xlu0 %1130 }
 0xa34   :  { %v1132_v6 = vrot.slane %v1131_v27, 4 }
 0xa36   :  { %v1133_v18 = vadd.f32 %v1132_v6, %v1131_v27 }
 0xa38   :  { %v1134_v32 = vrot.slane %v1133_v18, 2  ;;  %s1495_s20 = spop %1494 }
 0xa39   :  { %v1056_v36 = vstv %s1495_s20 }
 0xa3a   :  { %v1135_v48 = vadd.f32 %v1134_v32, %v1133_v18  ;;  %v1057_v37 = vadd.f32 %v1056_v36, %v812_v49 }
 0xa3c   :  { %v1136_v40 = vrot.slane %v1135_v48, 1 }
 0xa3e   :  { %v1137_v11 = vadd.f32 %v1136_v40, %v1135_v48 }
 0xa40   :  { %1496 = vpush %v1137_v11 }
 0xa41   :  { %1611 = shalt.err (!%p1608_p0)
}
 0xa42   :  { %1337 = dma.vmem_to_hbm [thread:$0]  %s1332_s0, 256, %s2137_s6, [#allocation4], %s1652_s15, %s1652_s15, %s1653_s16   ;;  %vm1324_vm5 = vcmask 8192  }
 0xa43   :  { %s1663_s25 = smov [#allocation8]  }
 0xa44   :  { %s1344_s2 = sshll.u32 %s1663_s25, 4  ;;  %s1345_s2 = int_to_ptr.vmem [resolvable:$true] %s1344_s2 }
 0xa45   :  { %s1620_s6 = scalar_lea.vmem %s1345_s2, 16  ;;  %s1624_s15 = scalar_lea.vmem %s1345_s2, 32 }
 0xa46   :  { %p1621_p1 = scmp.ne.s32.totalorder %s1345_s2, %s1620_s6  ;;  %p1625_p2 = scmp.lt.s32.totalorder %s1345_s2, %s1345_s2 }
 0xa47   :  { %p1626_p3 = scmp.lt.s32.totalorder %s1624_s15, %s1620_s6 }
 0xa49   :  { %p1627_p4 = por %p1626_p3, %p1625_p2 }
 0xa4b   :  { %p1628_p5 = pnand %p1627_p4, %p1621_p1 }
 0xa71   :  { %s1497_s23 = spop %1496 }
 0xa72   :  { %v1139_v45 = vstv %s1497_s23 }
 0xa73   :  { %1558 = vrsqrt.f32 %v1139_v45  ;;  %vm1142_vm0 = vcmp.eq.f32.partialorder %v1139_v45, inf  ;;  %v1145_v52 = vand.u32 2147483648, %v1139_v45  ;;  %vm1144_vm4 = vcmp.eq.f32.partialorder %v1139_v45, 0.0 }
 0xa80   :  { %v1559_v9 = vpop.eup %1558 }
 0xa81   :  { %v1141_v20 = vmul.f32 %v1559_v9, %v1139_v45 }
 0xa83   :  { %v1143_v53 = vsel %vm1142_vm0, %v1139_v45, %v1141_v20 }
 0xa84   :  { %v1146_v35 = vsel %vm1144_vm4, %v1145_v52, %v1143_v53 }
 0xa85   :  { %1498 = vpush %v1146_v35 }
 0xab6   :  { %s1499_s24 = spop %1498 }
 0xab7   :  { %v1148_v61 = vstv %s1499_s24 }
 0xab8   :  { %v1149_v54 = vadd.f32 %v1148_v61, %v2100_v19 }
 0xaba   :  { %v1323_v4 = vsel %vm1244_vm1, %v1057_v37, %v1149_v54 }
 0xabb   :  { %1325 = vst.msk [vmem:[#allocation8] sm:$0x1] %vm1324_vm5, %v1323_v4 }
 0xabc   :  { %1631 = shalt.err (!%p1628_p5)
}
 0xabd   :  { %1347 = dma.vmem_to_hbm [thread:$0]  %s1345_s2, 16, %s2138_s7, [#allocation9]   ;;  %vm1317_vm6 = vcmask 11264  }
 0xac0   :  { %v1313_v55 = vpop.f32.mrf.mxu1 }
 0xac1   :  { %1318 = vst.msk [vmem:[%s2139_s8] sm:$0xf] %vm1317_vm6, %v1313_v55 }
 0xac2   :  { %v1467_v44 = vpop.f32.mrf.mxu1 }
 0xac3   :  { %1644 = dma.done.wait [#allocation4], 256  }
 0xac4   :  { %1645 = vsyncadd [#allocation4], 4294967040 }
 0xac5   :  { %1646 = dma.done.wait [#allocation9], 16  }
 0xac6   :  { %1647 = vsyncadd [#allocation9], 4294967280 }
 0xac7   :  { %1358 = vsyncpa [#allocation3], 1 }
 0xac8   :  { %1359 = vsyncpa [#allocation6], 1 }
 0xac9   :  { %1360 = vsyncpa [#allocation4], 1 }
 0xaca   :  { %1361 = vsyncpa [#allocation9], 1 }

</bundles_post_ra>
